<compile_context>
chip_gen: v6e
topology: v6e:2x2x1
jax: 0.10.0
libtpu: 0.0.40
codegen_flags: <defaults>
</compile_context>

<pallas_src>
import math
import functools

import jax
import jax.numpy as jnp
from jax.experimental import pallas as pl
from jax.experimental.pallas import tpu as pltpu


def _feature_attention_kernel(
    x_ref, wqkv_ref, wo_ref, c_ref,          # inputs
    out_ref, attn_ref,                        # outputs
    ctx_ref, avgw_ref,                        # VMEM scratch
    *, num_heads: int, eps: float = 1e-5,
):
    Bt, L, E = x_ref.shape
    H = num_heads
    d = E // H

    # f32 copy for the residual + LayerNorm path; MXU is fed bf16.
    x32 = x_ref[...].astype(jnp.float32)                      # (Bt, L, E)
    xf = x32.reshape(Bt * L, E)
    xb = xf.astype(jnp.bfloat16)

    c = c_ref[...]                                             # (8, 3E) packed consts
    b_qkv = c[0:1, :]                                          # q-slice pre-scaled by 1/sqrt(d)
    b_o   = c[1:2, 0:E]
    ln_w  = c[2:3, 0:E]
    ln_b  = c[3:4, 0:E]

    # Fused QKV projection: one MXU pass, M = Bt*L, N = 3E, bf16 in / f32 accumulate.
    qkv = jnp.dot(xb, wqkv_ref[...], preferred_element_type=jnp.float32) + b_qkv
    qkv = qkv.astype(jnp.bfloat16).reshape(Bt, L, 3 * E)

    avgw_ref[...] = jnp.zeros_like(avgw_ref)

    # Per-head attention (H small & static).  Each head's context goes into its lane
    # slice of ctx_ref so the output projection below is a single K=E matmul.
    for h in range(H):
        qh = qkv[:, :, h * d:(h + 1) * d]                      # (Bt, L, d) bf16
        kh = qkv[:, :, E + h * d:E + (h + 1) * d]
        vh = qkv[:, :, 2 * E + h * d:2 * E + (h + 1) * d]
        s = jnp.einsum("bqd,bkd->bqk", qh, kh,
                       preferred_element_type=jnp.float32)     # (Bt, L, L)
        s = s - jnp.max(s, axis=-1, keepdims=True)
        p = jnp.exp(s)
        p = p * pl.reciprocal(jnp.sum(p, axis=-1, keepdims=True), approx=True)
        avgw_ref[...] += p
        ctx = jnp.einsum("bqk,bkd->bqd", p.astype(jnp.bfloat16), vh,
                         preferred_element_type=jnp.float32)   # (Bt, L, d)
        ctx_ref[:, h * d:(h + 1) * d] = ctx.reshape(Bt * L, d).astype(ctx_ref.dtype)

    attn_ref[...] = (avgw_ref[...] * (1.0 / H)).astype(attn_ref.dtype)

    # Single K=E output projection (bf16 in / f32 accumulate).
    attn_out = jnp.dot(ctx_ref[...], wo_ref[...], preferred_element_type=jnp.float32)

    # TODO(synk): dropout(p=0.1) on attn_out omitted (eval-mode identity).
    y = xf + attn_out + b_o                                    # residual + out-proj bias
    mean = jnp.mean(y, axis=-1, keepdims=True)
    var = jnp.mean(y * y, axis=-1, keepdims=True) - mean * mean   # one-pass variance
    y = (y - mean) * jax.lax.rsqrt(var + eps)
    y = y * ln_w + ln_b

    out_ref[...] = y.reshape(Bt, L, E).astype(out_ref.dtype)


def _vmem_caps():
    """(budget_bytes, two_tensorcore_part) — generation aware, with safe fallback."""
    try:
        cap = int(pltpu.get_tpu_info().vmem_capacity_bytes)
    except Exception:
        cap = 64 * 1024 * 1024
    budget = int(cap * 0.75)                 # leave headroom for Mosaic internal scratch
    two_tc = cap <= 64 * 1024 * 1024         # v7x-class parts: 64 MiB VMEM, 2 TCs/chip
    return budget, two_tc


def _choose_block_batch(B, L, E, budget_bytes, two_tc, row_target=512):
    """Sequences per grid step, sized to the VMEM budget (weights included)."""

    def est(bt):
        rows = bt * L
        io = 2 * (2 * rows * E * 4) + 2 * (bt * L * L * 4)     # x/out + attn blocks, double-buffered
        weights = (3 * E * E + E * E) * 2 + 8 * 3 * E * 4       # single-buffered bf16 weights + consts
        inter = (rows * 3 * E * 4                               # fused qkv f32
                 + rows * 3 * E * 2                             # qkv bf16 copy
                 + rows * E * 2                                 # ctx scratch (bf16)
                 + rows * E * 4 * 3                             # x f32, attn_out f32, y f32
                 + bt * L * L * 4 * 3)                          # scores, probs, avg_w scratch
        return int((io + weights + inter) * 1.25)               # Mosaic-internal headroom

    divisors = [v for v in range(1, B + 1) if B % v == 0]
    fits = [v for v in divisors if est(v) <= budget_bytes] or [1]
    if two_tc and B >= 2:
        # keep >= 2 'parallel' grid steps so both TensorCores get work
        fits = [v for v in fits if B // v >= 2] or [fits[0]]
    for v in fits:
        if v * L >= row_target:                                 # smallest block hitting the MXU M target
            return v
    return fits[-1]                                             # else the largest that fits


def feature_attention(x, params, *, num_heads):
    """x: (B, L, E) float32. Returns (LayerNorm(x + attn(x)), head-averaged weights)."""
    B, L, E = x.shape
    assert E % num_heads == 0
    d = E // num_heads
    scale = 1.0 / math.sqrt(d)

    # Fused, pre-transposed, pre-scaled QKV weight (bf16) + output projection (bf16).
    wqkv = jnp.concatenate(
        [params["wq"].T * scale, params["wk"].T, params["wv"].T], axis=1
    ).astype(jnp.bfloat16)                                      # (E, 3E)
    wo_t = params["wo"].T.astype(jnp.bfloat16)                  # (E, E)

    # Pack biases + LayerNorm params into one (8, 3E) f32 block (single DMA).
    consts = jnp.zeros((8, 3 * E), jnp.float32)
    consts = consts.at[0, 0:E].set(params["bq"] * scale)        # q bias pre-scaled
    consts = consts.at[0, E:2 * E].set(params["bk"])
    consts = consts.at[0, 2 * E:3 * E].set(params["bv"])
    consts = consts.at[1, 0:E].set(params["bo"])
    consts = consts.at[2, 0:E].set(params["ln_w"])
    consts = consts.at[3, 0:E].set(params["ln_b"])

    budget, two_tc = _vmem_caps()
    bt = _choose_block_batch(B, L, E, budget, two_tc)
    grid = (B // bt,)
    kernel = functools.partial(_feature_attention_kernel, num_heads=num_heads)

    def build(single_buffer_weights: bool):
        if single_buffer_weights:
            # Grid-invariant inputs: no point double-buffering them.
            wspec = lambda shape: pl.BlockSpec(shape, lambda b: (0, 0),
                                               pipeline_mode=pl.Buffered(1))
        else:
            wspec = lambda shape: pl.BlockSpec(shape, lambda b: (0, 0))
        return pl.pallas_call(
            kernel,
            out_shape=(
                jax.ShapeDtypeStruct((B, L, E), x.dtype),
                jax.ShapeDtypeStruct((B, L, L), jnp.float32),
            ),
            grid_spec=pltpu.PrefetchScalarGridSpec(
                num_scalar_prefetch=0,
                grid=grid,
                in_specs=[
                    pl.BlockSpec((bt, L, E), lambda b: (b, 0, 0)),  # x (Bt sequences)
                    wspec((E, 3 * E)),      # fused Wqkv^T (bf16)
                    wspec((E, E)),          # Wo^T (bf16)
                    wspec((8, 3 * E)),      # packed biases + LayerNorm params (f32)
                ],
                out_specs=[
                    pl.BlockSpec((bt, L, E), lambda b: (b, 0, 0)),
                    pl.BlockSpec((bt, L, L), lambda b: (b, 0, 0)),
                ],
                scratch_shapes=[
                    pltpu.VMEM((bt * L, E), jnp.bfloat16),   # per-head context slab
                    pltpu.VMEM((bt, L, L), jnp.float32),     # head-averaged weights acc
                ],
            ),
            compiler_params=pltpu.CompilerParams(
                dimension_semantics=("parallel",),
                vmem_limit_bytes=budget,
            ),
        )

    try:
        return build(True)(x, wqkv, wo_t, consts)
    except Exception:
        # Fallback if this jax build rejects single-buffered (Buffered(1)) inputs.
        return build(False)(x, wqkv, wo_t, consts)


def feature_attention_reference(x, params, *, num_heads):
    """Pure-JAX f32 reference (eval-mode, matching nn.MultiheadAttention semantics)."""
    B, L, E = x.shape
    d = E // num_heads
    q = x @ params["wq"].T + params["bq"]
    k = x @ params["wk"].T + params["bk"]
    v = x @ params["wv"].T + params["bv"]
    split = lambda t: t.reshape(B, L, num_heads, d).transpose(0, 2, 1, 3)
    qh, kh, vh = split(q), split(k), split(v)
    p = jax.nn.softmax(jnp.einsum("bhqd,bhkd->bhqk", qh, kh) / math.sqrt(d), axis=-1)
    ctx = jnp.einsum("bhqk,bhkd->bhqd", p, vh).transpose(0, 2, 1, 3).reshape(B, L, E)
    attn_out = ctx @ params["wo"].T + params["bo"]
    y = x + attn_out
    mean = y.mean(-1, keepdims=True)
    var = ((y - mean) ** 2).mean(-1, keepdims=True)
    y = (y - mean) / jnp.sqrt(var + 1e-5)
    return y * params["ln_w"] + params["ln_b"], p.mean(axis=1)


def init_params(key, embed_dim):
    """Deterministic synthetic init matching nn.MultiheadAttention parameter shapes."""
    E = embed_dim
    ks = jax.random.split(key, 10)
    s = 1.0 / math.sqrt(E)
    u = lambda k, shape: jax.random.uniform(k, shape, jnp.float32, -s, s)
    return dict(
        wq=u(ks[0], (E, E)), wk=u(ks[1], (E, E)),
        wv=u(ks[2], (E, E)), wo=u(ks[3], (E, E)),
        bq=u(ks[4], (E,)), bk=u(ks[5], (E,)),
        bv=u(ks[6], (E,)), bo=u(ks[7], (E,)),
        ln_w=1.0 + 0.1 * u(ks[8], (E,)),     # LayerNorm weight
        ln_b=0.1 * u(ks[9], (E,)),           # LayerNorm bias
    )


if __name__ == "__main__":
    B, L, E = 2, 8, 32
    NUM_HEADS = 4

    key = jax.random.PRNGKey(0)
    kx, kp = jax.random.split(key)
    x = jax.random.normal(kx, (B, L, E), jnp.float32)
    params = init_params(kp, E)

    out, attn_w = feature_attention(x, params, num_heads=NUM_HEADS)
    jax.block_until_ready((out, attn_w))

    assert out.shape == (B, L, E)
    assert attn_w.shape == (B, L, L)
    # attention weights are a softmax average over heads -> rows sum to 1
    # (lenient tolerance: bf16 MXU inputs + approx reciprocal)
    assert bool(jnp.allclose(jnp.sum(attn_w, axis=-1), 1.0, atol=1e-2))
    assert bool(jnp.all(jnp.isfinite(out)))

    # compare against pure-JAX f32 reference
    out_ref, attn_ref_w = feature_attention_reference(x, params, num_heads=NUM_HEADS)
    assert bool(jnp.max(jnp.abs(out - out_ref)) < 5e-2)
    assert bool(jnp.max(jnp.abs(attn_w - attn_ref_w)) < 2e-2)

    print("KERNEL_OK")
</pallas_src>

<mosaic_0001>
module attributes {stable_mosaic.version = 11 : i64} {
  func.func @_feature_attention_kernel(%arg0: i32, %arg1: memref<1x8x32xf32, #tpu.memory_space<vmem>>, %arg2: memref<32x96xbf16, #tpu.memory_space<vmem>>, %arg3: memref<32x32xbf16, #tpu.memory_space<vmem>>, %arg4: memref<8x96xf32, #tpu.memory_space<vmem>>, %arg5: memref<1x8x32xf32, #tpu.memory_space<vmem>>, %arg6: memref<1x8x8xf32, #tpu.memory_space<vmem>>, %arg7: memref<8x32xbf16, #tpu.memory_space<vmem>>, %arg8: memref<1x8x8xf32, #tpu.memory_space<vmem>>) attributes {dimension_semantics = [#tpu.dimension_semantics<parallel>], iteration_bounds = array<i64: 2>, scalar_prefetch = 0 : i64, scratch_operands = 2 : i64, tpu.core_type = #tpu.core_type<tc>, window_params = [{transform_indices = @transform_0, window_bounds = array<i64: 1, 8, 32>}, {pipeline_mode = #tpu.pipeline_mode<synchronous>, transform_indices = @transform_1, window_bounds = array<i64: 32, 96>}, {pipeline_mode = #tpu.pipeline_mode<synchronous>, transform_indices = @transform_2, window_bounds = array<i64: 32, 32>}, {pipeline_mode = #tpu.pipeline_mode<synchronous>, transform_indices = @transform_3, window_bounds = array<i64: 8, 96>}, {transform_indices = @transform_4, window_bounds = array<i64: 1, 8, 32>}, {transform_indices = @transform_5, window_bounds = array<i64: 1, 8, 8>}]} {
    %c0 = arith.constant 0 : index
    %c0_0 = arith.constant 0 : index
    %c0_1 = arith.constant 0 : index
    %0 = vector.load %arg1[%c0, %c0_0, %c0_1] : memref<1x8x32xf32, #tpu.memory_space<vmem>>, vector<1x8x32xf32>
    %1 = vector.shape_cast %0 : vector<1x8x32xf32> to vector<8x32xf32>
    %2 = arith.truncf %1 : vector<8x32xf32> to vector<8x32xbf16>
    %c0_2 = arith.constant 0 : index
    %c0_3 = arith.constant 0 : index
    %3 = vector.load %arg4[%c0_2, %c0_3] : memref<8x96xf32, #tpu.memory_space<vmem>>, vector<8x96xf32>
    %4 = vector.extract_strided_slice %3 {offsets = [0, 0], sizes = [1, 96], strides = [1, 1]} : vector<8x96xf32> to vector<1x96xf32>
    %5 = vector.extract_strided_slice %3 {offsets = [1, 0], sizes = [1, 32], strides = [1, 1]} : vector<8x96xf32> to vector<1x32xf32>
    %6 = vector.extract_strided_slice %3 {offsets = [2, 0], sizes = [1, 32], strides = [1, 1]} : vector<8x96xf32> to vector<1x32xf32>
    %7 = vector.extract_strided_slice %3 {offsets = [3, 0], sizes = [1, 32], strides = [1, 1]} : vector<8x96xf32> to vector<1x32xf32>
    %c0_4 = arith.constant 0 : index
    %c0_5 = arith.constant 0 : index
    %8 = vector.load %arg2[%c0_4, %c0_5] : memref<32x96xbf16, #tpu.memory_space<vmem>>, vector<32x96xbf16>
    %cst = arith.constant dense<0.000000e+00> : vector<8x96xf32>
    %9 = tpu.matmul %2, %8, %cst {dimension_numbers = #tpu.dot_dimension_numbers<[1], [0], [0], [1], [0, 0, 1, 1], [], []>} : vector<8x32xbf16>, vector<32x96xbf16>, vector<8x96xf32> -> vector<8x96xf32>
    %10 = vector.broadcast %4 : vector<1x96xf32> to vector<8x96xf32>
    %11 = arith.addf %9, %10 : vector<8x96xf32>
    %12 = arith.truncf %11 : vector<8x96xf32> to vector<8x96xbf16>
    %13 = vector.shape_cast %12 : vector<8x96xbf16> to vector<1x8x96xbf16>
    %cst_6 = arith.constant 0.000000e+00 : f32
    %14 = vector.broadcast %cst_6 : f32 to vector<1x8x8xf32>
    %c0_7 = arith.constant 0 : index
    %c0_8 = arith.constant 0 : index
    %c0_9 = arith.constant 0 : index
    %15 = vector.load %arg8[%c0_7, %c0_8, %c0_9] : memref<1x8x8xf32, #tpu.memory_space<vmem>>, vector<1x8x8xf32>
    tpu.vector_store %arg8[%c0_7, %c0_8, %c0_9], %14 {strides = array<i32>} : memref<1x8x8xf32, #tpu.memory_space<vmem>>, vector<1x8x8xf32>,
    %16 = vector.extract_strided_slice %13 {offsets = [0, 0, 0], sizes = [1, 8, 8], strides = [1, 1, 1]} : vector<1x8x96xbf16> to vector<1x8x8xbf16>
    %17 = vector.extract_strided_slice %13 {offsets = [0, 0, 32], sizes = [1, 8, 8], strides = [1, 1, 1]} : vector<1x8x96xbf16> to vector<1x8x8xbf16>
    %18 = vector.extract_strided_slice %13 {offsets = [0, 0, 64], sizes = [1, 8, 8], strides = [1, 1, 1]} : vector<1x8x96xbf16> to vector<1x8x8xbf16>
    "tpu.trace_start"() <{level = 10 : i32, message = "bqd,bkd->bqk"}> : () -> ()
    %cst_10 = arith.constant dense<0.000000e+00> : vector<1x8x8xf32>
    %19 = tpu.matmul %16, %17, %cst_10 {dimension_numbers = #tpu.dot_dimension_numbers<[2], [2], [1], [1], [0, 0, 0, 1, 1, 1], [0], [0]>} : vector<1x8x8xbf16>, vector<1x8x8xbf16>, vector<1x8x8xf32> -> vector<1x8x8xf32>
    "tpu.trace_stop"() : () -> ()
    %cst_11 = arith.constant dense<0xFF800000> : vector<1x8xf32>
    %20 = vector.multi_reduction <maximumf>, %19, %cst_11 [2] : vector<1x8x8xf32> to vector<1x8xf32>
    %21 = vector.shape_cast %20 : vector<1x8xf32> to vector<1x8x1xf32>
    %22 = vector.broadcast %21 : vector<1x8x1xf32> to vector<1x8x8xf32>
    %23 = arith.subf %19, %22 : vector<1x8x8xf32>
    %24 = math.exp %23 : vector<1x8x8xf32>
    %cst_12 = arith.constant dense<0.000000e+00> : vector<1x8xf32>
    %25 = vector.multi_reduction <add>, %24, %cst_12 [2] : vector<1x8x8xf32> to vector<1x8xf32>
    %26 = vector.shape_cast %25 : vector<1x8xf32> to vector<1x8x1xf32>
    %27 = tpu.reciprocal %26 {approx = true} : vector<1x8x1xf32> -> vector<1x8x1xf32>
    %28 = vector.broadcast %27 : vector<1x8x1xf32> to vector<1x8x8xf32>
    %29 = arith.mulf %24, %28 : vector<1x8x8xf32>
    %c0_13 = arith.constant 0 : index
    %c0_14 = arith.constant 0 : index
    %c0_15 = arith.constant 0 : index
    %30 = vector.load %arg8[%c0_13, %c0_14, %c0_15] : memref<1x8x8xf32, #tpu.memory_space<vmem>>, vector<1x8x8xf32>
    %31 = arith.addf %30, %29 : vector<1x8x8xf32>
    %c0_16 = arith.constant 0 : index
    %c0_17 = arith.constant 0 : index
    %c0_18 = arith.constant 0 : index
    %32 = vector.load %arg8[%c0_16, %c0_17, %c0_18] : memref<1x8x8xf32, #tpu.memory_space<vmem>>, vector<1x8x8xf32>
    tpu.vector_store %arg8[%c0_16, %c0_17, %c0_18], %31 {strides = array<i32>} : memref<1x8x8xf32, #tpu.memory_space<vmem>>, vector<1x8x8xf32>,
    %33 = arith.truncf %29 : vector<1x8x8xf32> to vector<1x8x8xbf16>
    "tpu.trace_start"() <{level = 10 : i32, message = "bqk,bkd->bqd"}> : () -> ()
    %cst_19 = arith.constant dense<0.000000e+00> : vector<1x8x8xf32>
    %34 = tpu.matmul %33, %18, %cst_19 {dimension_numbers = #tpu.dot_dimension_numbers<[2], [1], [1], [2], [0, 0, 0, 1, 1, 2], [0], [0]>} : vector<1x8x8xbf16>, vector<1x8x8xbf16>, vector<1x8x8xf32> -> vector<1x8x8xf32>
    "tpu.trace_stop"() : () -> ()
    %35 = vector.shape_cast %34 : vector<1x8x8xf32> to vector<8x8xf32>
    %36 = arith.truncf %35 : vector<8x8xf32> to vector<8x8xbf16>
    %c0_20 = arith.constant 0 : index
    %c0_21 = arith.constant 0 : index
    %37 = vector.load %arg7[%c0_20, %c0_21] : memref<8x32xbf16, #tpu.memory_space<vmem>>, vector<8x8xbf16>
    tpu.vector_store %arg7[%c0_20, %c0_21], %36 {strides = array<i32>} : memref<8x32xbf16, #tpu.memory_space<vmem>>, vector<8x8xbf16>,
    %38 = vector.extract_strided_slice %13 {offsets = [0, 0, 8], sizes = [1, 8, 8], strides = [1, 1, 1]} : vector<1x8x96xbf16> to vector<1x8x8xbf16>
    %39 = vector.extract_strided_slice %13 {offsets = [0, 0, 40], sizes = [1, 8, 8], strides = [1, 1, 1]} : vector<1x8x96xbf16> to vector<1x8x8xbf16>
    %40 = vector.extract_strided_slice %13 {offsets = [0, 0, 72], sizes = [1, 8, 8], strides = [1, 1, 1]} : vector<1x8x96xbf16> to vector<1x8x8xbf16>
    "tpu.trace_start"() <{level = 10 : i32, message = "bqd,bkd->bqk"}> : () -> ()
    %cst_22 = arith.constant dense<0.000000e+00> : vector<1x8x8xf32>
    %41 = tpu.matmul %38, %39, %cst_22 {dimension_numbers = #tpu.dot_dimension_numbers<[2], [2], [1], [1], [0, 0, 0, 1, 1, 1], [0], [0]>} : vector<1x8x8xbf16>, vector<1x8x8xbf16>, vector<1x8x8xf32> -> vector<1x8x8xf32>
    "tpu.trace_stop"() : () -> ()
    %cst_23 = arith.constant dense<0xFF800000> : vector<1x8xf32>
    %42 = vector.multi_reduction <maximumf>, %41, %cst_23 [2] : vector<1x8x8xf32> to vector<1x8xf32>
    %43 = vector.shape_cast %42 : vector<1x8xf32> to vector<1x8x1xf32>
    %44 = vector.broadcast %43 : vector<1x8x1xf32> to vector<1x8x8xf32>
    %45 = arith.subf %41, %44 : vector<1x8x8xf32>
    %46 = math.exp %45 : vector<1x8x8xf32>
    %cst_24 = arith.constant dense<0.000000e+00> : vector<1x8xf32>
    %47 = vector.multi_reduction <add>, %46, %cst_24 [2] : vector<1x8x8xf32> to vector<1x8xf32>
    %48 = vector.shape_cast %47 : vector<1x8xf32> to vector<1x8x1xf32>
    %49 = tpu.reciprocal %48 {approx = true} : vector<1x8x1xf32> -> vector<1x8x1xf32>
    %50 = vector.broadcast %49 : vector<1x8x1xf32> to vector<1x8x8xf32>
    %51 = arith.mulf %46, %50 : vector<1x8x8xf32>
    %c0_25 = arith.constant 0 : index
    %c0_26 = arith.constant 0 : index
    %c0_27 = arith.constant 0 : index
    %52 = vector.load %arg8[%c0_25, %c0_26, %c0_27] : memref<1x8x8xf32, #tpu.memory_space<vmem>>, vector<1x8x8xf32>
    %53 = arith.addf %52, %51 : vector<1x8x8xf32>
    %c0_28 = arith.constant 0 : index
    %c0_29 = arith.constant 0 : index
    %c0_30 = arith.constant 0 : index
    %54 = vector.load %arg8[%c0_28, %c0_29, %c0_30] : memref<1x8x8xf32, #tpu.memory_space<vmem>>, vector<1x8x8xf32>
    tpu.vector_store %arg8[%c0_28, %c0_29, %c0_30], %53 {strides = array<i32>} : memref<1x8x8xf32, #tpu.memory_space<vmem>>, vector<1x8x8xf32>,
    %55 = arith.truncf %51 : vector<1x8x8xf32> to vector<1x8x8xbf16>
    "tpu.trace_start"() <{level = 10 : i32, message = "bqk,bkd->bqd"}> : () -> ()
    %cst_31 = arith.constant dense<0.000000e+00> : vector<1x8x8xf32>
    %56 = tpu.matmul %55, %40, %cst_31 {dimension_numbers = #tpu.dot_dimension_numbers<[2], [1], [1], [2], [0, 0, 0, 1, 1, 2], [0], [0]>} : vector<1x8x8xbf16>, vector<1x8x8xbf16>, vector<1x8x8xf32> -> vector<1x8x8xf32>
    "tpu.trace_stop"() : () -> ()
    %57 = vector.shape_cast %56 : vector<1x8x8xf32> to vector<8x8xf32>
    %58 = arith.truncf %57 : vector<8x8xf32> to vector<8x8xbf16>
    %c0_32 = arith.constant 0 : index
    %c8 = arith.constant 8 : index
    %59 = vector.load %arg7[%c0_32, %c8] : memref<8x32xbf16, #tpu.memory_space<vmem>>, vector<8x8xbf16>
    tpu.vector_store %arg7[%c0_32, %c8], %58 {strides = array<i32>} : memref<8x32xbf16, #tpu.memory_space<vmem>>, vector<8x8xbf16>,
    %60 = vector.extract_strided_slice %13 {offsets = [0, 0, 16], sizes = [1, 8, 8], strides = [1, 1, 1]} : vector<1x8x96xbf16> to vector<1x8x8xbf16>
    %61 = vector.extract_strided_slice %13 {offsets = [0, 0, 48], sizes = [1, 8, 8], strides = [1, 1, 1]} : vector<1x8x96xbf16> to vector<1x8x8xbf16>
    %62 = vector.extract_strided_slice %13 {offsets = [0, 0, 80], sizes = [1, 8, 8], strides = [1, 1, 1]} : vector<1x8x96xbf16> to vector<1x8x8xbf16>
    "tpu.trace_start"() <{level = 10 : i32, message = "bqd,bkd->bqk"}> : () -> ()
    %cst_33 = arith.constant dense<0.000000e+00> : vector<1x8x8xf32>
    %63 = tpu.matmul %60, %61, %cst_33 {dimension_numbers = #tpu.dot_dimension_numbers<[2], [2], [1], [1], [0, 0, 0, 1, 1, 1], [0], [0]>} : vector<1x8x8xbf16>, vector<1x8x8xbf16>, vector<1x8x8xf32> -> vector<1x8x8xf32>
    "tpu.trace_stop"() : () -> ()
    %cst_34 = arith.constant dense<0xFF800000> : vector<1x8xf32>
    %64 = vector.multi_reduction <maximumf>, %63, %cst_34 [2] : vector<1x8x8xf32> to vector<1x8xf32>
    %65 = vector.shape_cast %64 : vector<1x8xf32> to vector<1x8x1xf32>
    %66 = vector.broadcast %65 : vector<1x8x1xf32> to vector<1x8x8xf32>
    %67 = arith.subf %63, %66 : vector<1x8x8xf32>
    %68 = math.exp %67 : vector<1x8x8xf32>
    %cst_35 = arith.constant dense<0.000000e+00> : vector<1x8xf32>
    %69 = vector.multi_reduction <add>, %68, %cst_35 [2] : vector<1x8x8xf32> to vector<1x8xf32>
    %70 = vector.shape_cast %69 : vector<1x8xf32> to vector<1x8x1xf32>
    %71 = tpu.reciprocal %70 {approx = true} : vector<1x8x1xf32> -> vector<1x8x1xf32>
    %72 = vector.broadcast %71 : vector<1x8x1xf32> to vector<1x8x8xf32>
    %73 = arith.mulf %68, %72 : vector<1x8x8xf32>
    %c0_36 = arith.constant 0 : index
    %c0_37 = arith.constant 0 : index
    %c0_38 = arith.constant 0 : index
    %74 = vector.load %arg8[%c0_36, %c0_37, %c0_38] : memref<1x8x8xf32, #tpu.memory_space<vmem>>, vector<1x8x8xf32>
    %75 = arith.addf %74, %73 : vector<1x8x8xf32>
    %c0_39 = arith.constant 0 : index
    %c0_40 = arith.constant 0 : index
    %c0_41 = arith.constant 0 : index
    %76 = vector.load %arg8[%c0_39, %c0_40, %c0_41] : memref<1x8x8xf32, #tpu.memory_space<vmem>>, vector<1x8x8xf32>
    tpu.vector_store %arg8[%c0_39, %c0_40, %c0_41], %75 {strides = array<i32>} : memref<1x8x8xf32, #tpu.memory_space<vmem>>, vector<1x8x8xf32>,
    %77 = arith.truncf %73 : vector<1x8x8xf32> to vector<1x8x8xbf16>
    "tpu.trace_start"() <{level = 10 : i32, message = "bqk,bkd->bqd"}> : () -> ()
    %cst_42 = arith.constant dense<0.000000e+00> : vector<1x8x8xf32>
    %78 = tpu.matmul %77, %62, %cst_42 {dimension_numbers = #tpu.dot_dimension_numbers<[2], [1], [1], [2], [0, 0, 0, 1, 1, 2], [0], [0]>} : vector<1x8x8xbf16>, vector<1x8x8xbf16>, vector<1x8x8xf32> -> vector<1x8x8xf32>
    "tpu.trace_stop"() : () -> ()
    %79 = vector.shape_cast %78 : vector<1x8x8xf32> to vector<8x8xf32>
    %80 = arith.truncf %79 : vector<8x8xf32> to vector<8x8xbf16>
    %c0_43 = arith.constant 0 : index
    %c16 = arith.constant 16 : index
    %81 = vector.load %arg7[%c0_43, %c16] : memref<8x32xbf16, #tpu.memory_space<vmem>>, vector<8x8xbf16>
    tpu.vector_store %arg7[%c0_43, %c16], %80 {strides = array<i32>} : memref<8x32xbf16, #tpu.memory_space<vmem>>, vector<8x8xbf16>,
    %82 = vector.extract_strided_slice %13 {offsets = [0, 0, 24], sizes = [1, 8, 8], strides = [1, 1, 1]} : vector<1x8x96xbf16> to vector<1x8x8xbf16>
    %83 = vector.extract_strided_slice %13 {offsets = [0, 0, 56], sizes = [1, 8, 8], strides = [1, 1, 1]} : vector<1x8x96xbf16> to vector<1x8x8xbf16>
    %84 = vector.extract_strided_slice %13 {offsets = [0, 0, 88], sizes = [1, 8, 8], strides = [1, 1, 1]} : vector<1x8x96xbf16> to vector<1x8x8xbf16>
    "tpu.trace_start"() <{level = 10 : i32, message = "bqd,bkd->bqk"}> : () -> ()
    %cst_44 = arith.constant dense<0.000000e+00> : vector<1x8x8xf32>
    %85 = tpu.matmul %82, %83, %cst_44 {dimension_numbers = #tpu.dot_dimension_numbers<[2], [2], [1], [1], [0, 0, 0, 1, 1, 1], [0], [0]>} : vector<1x8x8xbf16>, vector<1x8x8xbf16>, vector<1x8x8xf32> -> vector<1x8x8xf32>
    "tpu.trace_stop"() : () -> ()
    %cst_45 = arith.constant dense<0xFF800000> : vector<1x8xf32>
    %86 = vector.multi_reduction <maximumf>, %85, %cst_45 [2] : vector<1x8x8xf32> to vector<1x8xf32>
    %87 = vector.shape_cast %86 : vector<1x8xf32> to vector<1x8x1xf32>
    %88 = vector.broadcast %87 : vector<1x8x1xf32> to vector<1x8x8xf32>
    %89 = arith.subf %85, %88 : vector<1x8x8xf32>
    %90 = math.exp %89 : vector<1x8x8xf32>
    %cst_46 = arith.constant dense<0.000000e+00> : vector<1x8xf32>
    %91 = vector.multi_reduction <add>, %90, %cst_46 [2] : vector<1x8x8xf32> to vector<1x8xf32>
    %92 = vector.shape_cast %91 : vector<1x8xf32> to vector<1x8x1xf32>
    %93 = tpu.reciprocal %92 {approx = true} : vector<1x8x1xf32> -> vector<1x8x1xf32>
    %94 = vector.broadcast %93 : vector<1x8x1xf32> to vector<1x8x8xf32>
    %95 = arith.mulf %90, %94 : vector<1x8x8xf32>
    %c0_47 = arith.constant 0 : index
    %c0_48 = arith.constant 0 : index
    %c0_49 = arith.constant 0 : index
    %96 = vector.load %arg8[%c0_47, %c0_48, %c0_49] : memref<1x8x8xf32, #tpu.memory_space<vmem>>, vector<1x8x8xf32>
    %97 = arith.addf %96, %95 : vector<1x8x8xf32>
    %c0_50 = arith.constant 0 : index
    %c0_51 = arith.constant 0 : index
    %c0_52 = arith.constant 0 : index
    %98 = vector.load %arg8[%c0_50, %c0_51, %c0_52] : memref<1x8x8xf32, #tpu.memory_space<vmem>>, vector<1x8x8xf32>
    tpu.vector_store %arg8[%c0_50, %c0_51, %c0_52], %97 {strides = array<i32>} : memref<1x8x8xf32, #tpu.memory_space<vmem>>, vector<1x8x8xf32>,
    %99 = arith.truncf %95 : vector<1x8x8xf32> to vector<1x8x8xbf16>
    "tpu.trace_start"() <{level = 10 : i32, message = "bqk,bkd->bqd"}> : () -> ()
    %cst_53 = arith.constant dense<0.000000e+00> : vector<1x8x8xf32>
    %100 = tpu.matmul %99, %84, %cst_53 {dimension_numbers = #tpu.dot_dimension_numbers<[2], [1], [1], [2], [0, 0, 0, 1, 1, 2], [0], [0]>} : vector<1x8x8xbf16>, vector<1x8x8xbf16>, vector<1x8x8xf32> -> vector<1x8x8xf32>
    "tpu.trace_stop"() : () -> ()
    %101 = vector.shape_cast %100 : vector<1x8x8xf32> to vector<8x8xf32>
    %102 = arith.truncf %101 : vector<8x8xf32> to vector<8x8xbf16>
    %c0_54 = arith.constant 0 : index
    %c24 = arith.constant 24 : index
    %103 = vector.load %arg7[%c0_54, %c24] : memref<8x32xbf16, #tpu.memory_space<vmem>>, vector<8x8xbf16>
    tpu.vector_store %arg7[%c0_54, %c24], %102 {strides = array<i32>} : memref<8x32xbf16, #tpu.memory_space<vmem>>, vector<8x8xbf16>,
    %c0_55 = arith.constant 0 : index
    %c0_56 = arith.constant 0 : index
    %c0_57 = arith.constant 0 : index
    %104 = vector.load %arg8[%c0_55, %c0_56, %c0_57] : memref<1x8x8xf32, #tpu.memory_space<vmem>>, vector<1x8x8xf32>
    %cst_58 = arith.constant 2.500000e-01 : f32
    %105 = vector.broadcast %cst_58 : f32 to vector<1x8x8xf32>
    %106 = arith.mulf %104, %105 : vector<1x8x8xf32>
    %c0_59 = arith.constant 0 : index
    %c0_60 = arith.constant 0 : index
    %c0_61 = arith.constant 0 : index
    %107 = vector.load %arg6[%c0_59, %c0_60, %c0_61] : memref<1x8x8xf32, #tpu.memory_space<vmem>>, vector<1x8x8xf32>
    tpu.vector_store %arg6[%c0_59, %c0_60, %c0_61], %106 {strides = array<i32>} : memref<1x8x8xf32, #tpu.memory_space<vmem>>, vector<1x8x8xf32>,
    %c0_62 = arith.constant 0 : index
    %c0_63 = arith.constant 0 : index
    %108 = vector.load %arg7[%c0_62, %c0_63] : memref<8x32xbf16, #tpu.memory_space<vmem>>, vector<8x32xbf16>
    %c0_64 = arith.constant 0 : index
    %c0_65 = arith.constant 0 : index
    %109 = vector.load %arg3[%c0_64, %c0_65] : memref<32x32xbf16, #tpu.memory_space<vmem>>, vector<32x32xbf16>
    %cst_66 = arith.constant dense<0.000000e+00> : vector<8x32xf32>
    %110 = tpu.matmul %108, %109, %cst_66 {dimension_numbers = #tpu.dot_dimension_numbers<[1], [0], [0], [1], [0, 0, 1, 1], [], []>} : vector<8x32xbf16>, vector<32x32xbf16>, vector<8x32xf32> -> vector<8x32xf32>
    %111 = arith.addf %1, %110 : vector<8x32xf32>
    %112 = vector.broadcast %5 : vector<1x32xf32> to vector<8x32xf32>
    %113 = arith.addf %111, %112 : vector<8x32xf32>
    %cst_67 = arith.constant dense<0.000000e+00> : vector<8xf32>
    %114 = vector.multi_reduction <add>, %113, %cst_67 [1] : vector<8x32xf32> to vector<8xf32>
    %115 = vector.shape_cast %114 : vector<8xf32> to vector<8x1xf32>
    %cst_68 = arith.constant 3.200000e+01 : f32
    %116 = vector.broadcast %cst_68 : f32 to vector<8x1xf32>
    %117 = arith.divf %115, %116 : vector<8x1xf32>
    %118 = arith.mulf %113, %113 : vector<8x32xf32>
    %cst_69 = arith.constant dense<0.000000e+00> : vector<8xf32>
    %119 = vector.multi_reduction <add>, %118, %cst_69 [1] : vector<8x32xf32> to vector<8xf32>
    %120 = vector.shape_cast %119 : vector<8xf32> to vector<8x1xf32>
    %cst_70 = arith.constant 3.200000e+01 : f32
    %121 = vector.broadcast %cst_70 : f32 to vector<8x1xf32>
    %122 = arith.divf %120, %121 : vector<8x1xf32>
    %123 = arith.mulf %117, %117 : vector<8x1xf32>
    %124 = arith.subf %122, %123 : vector<8x1xf32>
    %125 = vector.broadcast %117 : vector<8x1xf32> to vector<8x32xf32>
    %126 = arith.subf %113, %125 : vector<8x32xf32>
    %cst_71 = arith.constant 9.99999974E-6 : f32
    %127 = vector.broadcast %cst_71 : f32 to vector<8x1xf32>
    %128 = arith.addf %124, %127 : vector<8x1xf32>
    %129 = math.rsqrt %128 : vector<8x1xf32>
    %130 = vector.broadcast %129 : vector<8x1xf32> to vector<8x32xf32>
    %131 = arith.mulf %126, %130 : vector<8x32xf32>
    %132 = vector.broadcast %6 : vector<1x32xf32> to vector<8x32xf32>
    %133 = arith.mulf %131, %132 : vector<8x32xf32>
    %134 = vector.broadcast %7 : vector<1x32xf32> to vector<8x32xf32>
    %135 = arith.addf %133, %134 : vector<8x32xf32>
    %136 = vector.shape_cast %135 : vector<8x32xf32> to vector<1x8x32xf32>
    %c0_72 = arith.constant 0 : index
    %c0_73 = arith.constant 0 : index
    %c0_74 = arith.constant 0 : index
    %137 = vector.load %arg5[%c0_72, %c0_73, %c0_74] : memref<1x8x32xf32, #tpu.memory_space<vmem>>, vector<1x8x32xf32>
    tpu.vector_store %arg5[%c0_72, %c0_73, %c0_74], %136 {strides = array<i32>} : memref<1x8x32xf32, #tpu.memory_space<vmem>>, vector<1x8x32xf32>,
    return
  }
  func.func @transform_0(%arg0: i32) -> (i32, i32, i32) {
    %c0_i32 = arith.constant 0 : i32
    %c0_i32_0 = arith.constant 0 : i32
    %c0_i32_1 = arith.constant 0 : i32
    return %arg0, %c0_i32, %c0_i32_0 : i32, i32, i32
  }
  func.func @transform_1(%arg0: i32) -> (i32, i32) {
    %c0_i32 = arith.constant 0 : i32
    %c0_i32_0 = arith.constant 0 : i32
    %c0_i32_1 = arith.constant 0 : i32
    return %c0_i32, %c0_i32_0 : i32, i32
  }
  func.func @transform_2(%arg0: i32) -> (i32, i32) {
    %c0_i32 = arith.constant 0 : i32
    %c0_i32_0 = arith.constant 0 : i32
    %c0_i32_1 = arith.constant 0 : i32
    return %c0_i32, %c0_i32_0 : i32, i32
  }
  func.func @transform_3(%arg0: i32) -> (i32, i32) {
    %c0_i32 = arith.constant 0 : i32
    %c0_i32_0 = arith.constant 0 : i32
    %c0_i32_1 = arith.constant 0 : i32
    return %c0_i32, %c0_i32_0 : i32, i32
  }
  func.func @transform_4(%arg0: i32) -> (i32, i32, i32) {
    %c0_i32 = arith.constant 0 : i32
    %c0_i32_0 = arith.constant 0 : i32
    %c0_i32_1 = arith.constant 0 : i32
    return %arg0, %c0_i32, %c0_i32_0 : i32, i32, i32
  }
  func.func @transform_5(%arg0: i32) -> (i32, i32, i32) {
    %c0_i32 = arith.constant 0 : i32
    %c0_i32_0 = arith.constant 0 : i32
    %c0_i32_1 = arith.constant 0 : i32
    return %arg0, %c0_i32, %c0_i32_0 : i32, i32, i32
  }
}

module attributes {stable_mosaic.version = 11 : i64} {
  func.func @_feature_attention_kernel(%arg0: i32, %arg1: memref<1x8x32xf32, #tpu.memory_space<vmem>>, %arg2: memref<32x96xbf16, #tpu.memory_space<vmem>>, %arg3: memref<32x32xbf16, #tpu.memory_space<vmem>>, %arg4: memref<8x96xf32, #tpu.memory_space<vmem>>, %arg5: memref<1x8x32xf32, #tpu.memory_space<vmem>>, %arg6: memref<1x8x8xf32, #tpu.memory_space<vmem>>, %arg7: memref<8x32xbf16, #tpu.memory_space<vmem>>, %arg8: memref<1x8x8xf32, #tpu.memory_space<vmem>>) attributes {dimension_semantics = [#tpu.dimension_semantics<parallel>], iteration_bounds = array<i64: 2>, scalar_prefetch = 0 : i64, scratch_operands = 2 : i64, tpu.core_type = #tpu.core_type<tc>, window_params = [{transform_indices = @transform_0, window_bounds = array<i64: 1, 8, 32>}, {pipeline_mode = #tpu.pipeline_mode<synchronous>, transform_indices = @transform_1, window_bounds = array<i64: 32, 96>}, {pipeline_mode = #tpu.pipeline_mode<synchronous>, transform_indices = @transform_2, window_bounds = array<i64: 32, 32>}, {pipeline_mode = #tpu.pipeline_mode<synchronous>, transform_indices = @transform_3, window_bounds = array<i64: 8, 96>}, {transform_indices = @transform_4, window_bounds = array<i64: 1, 8, 32>}, {transform_indices = @transform_5, window_bounds = array<i64: 1, 8, 8>}]} {
    %c0 = arith.constant 0 : index
    %c0_0 = arith.constant 0 : index
    %c0_1 = arith.constant 0 : index
    %0 = vector.load %arg1[%c0, %c0_0, %c0_1] : memref<1x8x32xf32, #tpu.memory_space<vmem>>, vector<1x8x32xf32>
    %1 = vector.shape_cast %0 : vector<1x8x32xf32> to vector<8x32xf32>
    %2 = arith.truncf %1 : vector<8x32xf32> to vector<8x32xbf16>
    %c0_2 = arith.constant 0 : index
    %c0_3 = arith.constant 0 : index
    %3 = vector.load %arg4[%c0_2, %c0_3] : memref<8x96xf32, #tpu.memory_space<vmem>>, vector<8x96xf32>
    %4 = vector.extract_strided_slice %3 {offsets = [0, 0], sizes = [1, 96], strides = [1, 1]} : vector<8x96xf32> to vector<1x96xf32>
    %5 = vector.extract_strided_slice %3 {offsets = [1, 0], sizes = [1, 32], strides = [1, 1]} : vector<8x96xf32> to vector<1x32xf32>
    %6 = vector.extract_strided_slice %3 {offsets = [2, 0], sizes = [1, 32], strides = [1, 1]} : vector<8x96xf32> to vector<1x32xf32>
    %7 = vector.extract_strided_slice %3 {offsets = [3, 0], sizes = [1, 32], strides = [1, 1]} : vector<8x96xf32> to vector<1x32xf32>
    %c0_4 = arith.constant 0 : index
    %c0_5 = arith.constant 0 : index
    %8 = vector.load %arg2[%c0_4, %c0_5] : memref<32x96xbf16, #tpu.memory_space<vmem>>, vector<32x96xbf16>
    %cst = arith.constant dense<0.000000e+00> : vector<8x96xf32>
    %9 = tpu.matmul %2, %8, %cst {dimension_numbers = #tpu.dot_dimension_numbers<[1], [0], [0], [1], [0, 0, 1, 1], [], []>} : vector<8x32xbf16>, vector<32x96xbf16>, vector<8x96xf32> -> vector<8x96xf32>
    %10 = vector.broadcast %4 : vector<1x96xf32> to vector<8x96xf32>
    %11 = arith.addf %9, %10 : vector<8x96xf32>
    %12 = arith.truncf %11 : vector<8x96xf32> to vector<8x96xbf16>
    %13 = vector.shape_cast %12 : vector<8x96xbf16> to vector<1x8x96xbf16>
    %cst_6 = arith.constant 0.000000e+00 : f32
    %14 = vector.broadcast %cst_6 : f32 to vector<1x8x8xf32>
    %c0_7 = arith.constant 0 : index
    %c0_8 = arith.constant 0 : index
    %c0_9 = arith.constant 0 : index
    %15 = vector.load %arg8[%c0_7, %c0_8, %c0_9] : memref<1x8x8xf32, #tpu.memory_space<vmem>>, vector<1x8x8xf32>
    tpu.vector_store %arg8[%c0_7, %c0_8, %c0_9], %14 {strides = array<i32>} : memref<1x8x8xf32, #tpu.memory_space<vmem>>, vector<1x8x8xf32>,
    %16 = vector.extract_strided_slice %13 {offsets = [0, 0, 0], sizes = [1, 8, 8], strides = [1, 1, 1]} : vector<1x8x96xbf16> to vector<1x8x8xbf16>
    %17 = vector.extract_strided_slice %13 {offsets = [0, 0, 32], sizes = [1, 8, 8], strides = [1, 1, 1]} : vector<1x8x96xbf16> to vector<1x8x8xbf16>
    %18 = vector.extract_strided_slice %13 {offsets = [0, 0, 64], sizes = [1, 8, 8], strides = [1, 1, 1]} : vector<1x8x96xbf16> to vector<1x8x8xbf16>
    "tpu.trace_start"() <{level = 10 : i32, message = "bqd,bkd->bqk"}> : () -> ()
    %cst_10 = arith.constant dense<0.000000e+00> : vector<1x8x8xf32>
    %19 = tpu.matmul %16, %17, %cst_10 {dimension_numbers = #tpu.dot_dimension_numbers<[2], [2], [1], [1], [0, 0, 0, 1, 1, 1], [0], [0]>} : vector<1x8x8xbf16>, vector<1x8x8xbf16>, vector<1x8x8xf32> -> vector<1x8x8xf32>
    "tpu.trace_stop"() : () -> ()
    %cst_11 = arith.constant dense<0xFF800000> : vector<1x8xf32>
    %20 = vector.multi_reduction <maximumf>, %19, %cst_11 [2] : vector<1x8x8xf32> to vector<1x8xf32>
    %21 = vector.shape_cast %20 : vector<1x8xf32> to vector<1x8x1xf32>
    %22 = vector.broadcast %21 : vector<1x8x1xf32> to vector<1x8x8xf32>
    %23 = arith.subf %19, %22 : vector<1x8x8xf32>
    %24 = math.exp %23 : vector<1x8x8xf32>
    %cst_12 = arith.constant dense<0.000000e+00> : vector<1x8xf32>
    %25 = vector.multi_reduction <add>, %24, %cst_12 [2] : vector<1x8x8xf32> to vector<1x8xf32>
    %26 = vector.shape_cast %25 : vector<1x8xf32> to vector<1x8x1xf32>
    %27 = tpu.reciprocal %26 {approx = true} : vector<1x8x1xf32> -> vector<1x8x1xf32>
    %28 = vector.broadcast %27 : vector<1x8x1xf32> to vector<1x8x8xf32>
    %29 = arith.mulf %24, %28 : vector<1x8x8xf32>
    %c0_13 = arith.constant 0 : index
    %c0_14 = arith.constant 0 : index
    %c0_15 = arith.constant 0 : index
    %30 = vector.load %arg8[%c0_13, %c0_14, %c0_15] : memref<1x8x8xf32, #tpu.memory_space<vmem>>, vector<1x8x8xf32>
    %31 = arith.addf %30, %29 : vector<1x8x8xf32>
    %c0_16 = arith.constant 0 : index
    %c0_17 = arith.constant 0 : index
    %c0_18 = arith.constant 0 : index
    %32 = vector.load %arg8[%c0_16, %c0_17, %c0_18] : memref<1x8x8xf32, #tpu.memory_space<vmem>>, vector<1x8x8xf32>
    tpu.vector_store %arg8[%c0_16, %c0_17, %c0_18], %31 {strides = array<i32>} : memref<1x8x8xf32, #tpu.memory_space<vmem>>, vector<1x8x8xf32>,
    %33 = arith.truncf %29 : vector<1x8x8xf32> to vector<1x8x8xbf16>
    "tpu.trace_start"() <{level = 10 : i32, message = "bqk,bkd->bqd"}> : () -> ()
    %cst_19 = arith.constant dense<0.000000e+00> : vector<1x8x8xf32>
    %34 = tpu.matmul %33, %18, %cst_19 {dimension_numbers = #tpu.dot_dimension_numbers<[2], [1], [1], [2], [0, 0, 0, 1, 1, 2], [0], [0]>} : vector<1x8x8xbf16>, vector<1x8x8xbf16>, vector<1x8x8xf32> -> vector<1x8x8xf32>
    "tpu.trace_stop"() : () -> ()
    %35 = vector.shape_cast %34 : vector<1x8x8xf32> to vector<8x8xf32>
    %36 = arith.truncf %35 : vector<8x8xf32> to vector<8x8xbf16>
    %c0_20 = arith.constant 0 : index
    %c0_21 = arith.constant 0 : index
    %37 = vector.load %arg7[%c0_20, %c0_21] : memref<8x32xbf16, #tpu.memory_space<vmem>>, vector<8x8xbf16>
    tpu.vector_store %arg7[%c0_20, %c0_21], %36 {strides = array<i32>} : memref<8x32xbf16, #tpu.memory_space<vmem>>, vector<8x8xbf16>,
    %38 = vector.extract_strided_slice %13 {offsets = [0, 0, 8], sizes = [1, 8, 8], strides = [1, 1, 1]} : vector<1x8x96xbf16> to vector<1x8x8xbf16>
    %39 = vector.extract_strided_slice %13 {offsets = [0, 0, 40], sizes = [1, 8, 8], strides = [1, 1, 1]} : vector<1x8x96xbf16> to vector<1x8x8xbf16>
    %40 = vector.extract_strided_slice %13 {offsets = [0, 0, 72], sizes = [1, 8, 8], strides = [1, 1, 1]} : vector<1x8x96xbf16> to vector<1x8x8xbf16>
    "tpu.trace_start"() <{level = 10 : i32, message = "bqd,bkd->bqk"}> : () -> ()
    %cst_22 = arith.constant dense<0.000000e+00> : vector<1x8x8xf32>
    %41 = tpu.matmul %38, %39, %cst_22 {dimension_numbers = #tpu.dot_dimension_numbers<[2], [2], [1], [1], [0, 0, 0, 1, 1, 1], [0], [0]>} : vector<1x8x8xbf16>, vector<1x8x8xbf16>, vector<1x8x8xf32> -> vector<1x8x8xf32>
    "tpu.trace_stop"() : () -> ()
    %cst_23 = arith.constant dense<0xFF800000> : vector<1x8xf32>
    %42 = vector.multi_reduction <maximumf>, %41, %cst_23 [2] : vector<1x8x8xf32> to vector<1x8xf32>
    %43 = vector.shape_cast %42 : vector<1x8xf32> to vector<1x8x1xf32>
    %44 = vector.broadcast %43 : vector<1x8x1xf32> to vector<1x8x8xf32>
    %45 = arith.subf %41, %44 : vector<1x8x8xf32>
    %46 = math.exp %45 : vector<1x8x8xf32>
    %cst_24 = arith.constant dense<0.000000e+00> : vector<1x8xf32>
    %47 = vector.multi_reduction <add>, %46, %cst_24 [2] : vector<1x8x8xf32> to vector<1x8xf32>
    %48 = vector.shape_cast %47 : vector<1x8xf32> to vector<1x8x1xf32>
    %49 = tpu.reciprocal %48 {approx = true} : vector<1x8x1xf32> -> vector<1x8x1xf32>
    %50 = vector.broadcast %49 : vector<1x8x1xf32> to vector<1x8x8xf32>
    %51 = arith.mulf %46, %50 : vector<1x8x8xf32>
    %c0_25 = arith.constant 0 : index
    %c0_26 = arith.constant 0 : index
    %c0_27 = arith.constant 0 : index
    %52 = vector.load %arg8[%c0_25, %c0_26, %c0_27] : memref<1x8x8xf32, #tpu.memory_space<vmem>>, vector<1x8x8xf32>
    %53 = arith.addf %52, %51 : vector<1x8x8xf32>
    %c0_28 = arith.constant 0 : index
    %c0_29 = arith.constant 0 : index
    %c0_30 = arith.constant 0 : index
    %54 = vector.load %arg8[%c0_28, %c0_29, %c0_30] : memref<1x8x8xf32, #tpu.memory_space<vmem>>, vector<1x8x8xf32>
    tpu.vector_store %arg8[%c0_28, %c0_29, %c0_30], %53 {strides = array<i32>} : memref<1x8x8xf32, #tpu.memory_space<vmem>>, vector<1x8x8xf32>,
    %55 = arith.truncf %51 : vector<1x8x8xf32> to vector<1x8x8xbf16>
    "tpu.trace_start"() <{level = 10 : i32, message = "bqk,bkd->bqd"}> : () -> ()
    %cst_31 = arith.constant dense<0.000000e+00> : vector<1x8x8xf32>
    %56 = tpu.matmul %55, %40, %cst_31 {dimension_numbers = #tpu.dot_dimension_numbers<[2], [1], [1], [2], [0, 0, 0, 1, 1, 2], [0], [0]>} : vector<1x8x8xbf16>, vector<1x8x8xbf16>, vector<1x8x8xf32> -> vector<1x8x8xf32>
    "tpu.trace_stop"() : () -> ()
    %57 = vector.shape_cast %56 : vector<1x8x8xf32> to vector<8x8xf32>
    %58 = arith.truncf %57 : vector<8x8xf32> to vector<8x8xbf16>
    %c0_32 = arith.constant 0 : index
    %c8 = arith.constant 8 : index
    %59 = vector.load %arg7[%c0_32, %c8] : memref<8x32xbf16, #tpu.memory_space<vmem>>, vector<8x8xbf16>
    tpu.vector_store %arg7[%c0_32, %c8], %58 {strides = array<i32>} : memref<8x32xbf16, #tpu.memory_space<vmem>>, vector<8x8xbf16>,
    %60 = vector.extract_strided_slice %13 {offsets = [0, 0, 16], sizes = [1, 8, 8], strides = [1, 1, 1]} : vector<1x8x96xbf16> to vector<1x8x8xbf16>
    %61 = vector.extract_strided_slice %13 {offsets = [0, 0, 48], sizes = [1, 8, 8], strides = [1, 1, 1]} : vector<1x8x96xbf16> to vector<1x8x8xbf16>
    %62 = vector.extract_strided_slice %13 {offsets = [0, 0, 80], sizes = [1, 8, 8], strides = [1, 1, 1]} : vector<1x8x96xbf16> to vector<1x8x8xbf16>
    "tpu.trace_start"() <{level = 10 : i32, message = "bqd,bkd->bqk"}> : () -> ()
    %cst_33 = arith.constant dense<0.000000e+00> : vector<1x8x8xf32>
    %63 = tpu.matmul %60, %61, %cst_33 {dimension_numbers = #tpu.dot_dimension_numbers<[2], [2], [1], [1], [0, 0, 0, 1, 1, 1], [0], [0]>} : vector<1x8x8xbf16>, vector<1x8x8xbf16>, vector<1x8x8xf32> -> vector<1x8x8xf32>
    "tpu.trace_stop"() : () -> ()
    %cst_34 = arith.constant dense<0xFF800000> : vector<1x8xf32>
    %64 = vector.multi_reduction <maximumf>, %63, %cst_34 [2] : vector<1x8x8xf32> to vector<1x8xf32>
    %65 = vector.shape_cast %64 : vector<1x8xf32> to vector<1x8x1xf32>
    %66 = vector.broadcast %65 : vector<1x8x1xf32> to vector<1x8x8xf32>
    %67 = arith.subf %63, %66 : vector<1x8x8xf32>
    %68 = math.exp %67 : vector<1x8x8xf32>
    %cst_35 = arith.constant dense<0.000000e+00> : vector<1x8xf32>
    %69 = vector.multi_reduction <add>, %68, %cst_35 [2] : vector<1x8x8xf32> to vector<1x8xf32>
    %70 = vector.shape_cast %69 : vector<1x8xf32> to vector<1x8x1xf32>
    %71 = tpu.reciprocal %70 {approx = true} : vector<1x8x1xf32> -> vector<1x8x1xf32>
    %72 = vector.broadcast %71 : vector<1x8x1xf32> to vector<1x8x8xf32>
    %73 = arith.mulf %68, %72 : vector<1x8x8xf32>
    %c0_36 = arith.constant 0 : index
    %c0_37 = arith.constant 0 : index
    %c0_38 = arith.constant 0 : index
    %74 = vector.load %arg8[%c0_36, %c0_37, %c0_38] : memref<1x8x8xf32, #tpu.memory_space<vmem>>, vector<1x8x8xf32>
    %75 = arith.addf %74, %73 : vector<1x8x8xf32>
    %c0_39 = arith.constant 0 : index
    %c0_40 = arith.constant 0 : index
    %c0_41 = arith.constant 0 : index
    %76 = vector.load %arg8[%c0_39, %c0_40, %c0_41] : memref<1x8x8xf32, #tpu.memory_space<vmem>>, vector<1x8x8xf32>
    tpu.vector_store %arg8[%c0_39, %c0_40, %c0_41], %75 {strides = array<i32>} : memref<1x8x8xf32, #tpu.memory_space<vmem>>, vector<1x8x8xf32>,
    %77 = arith.truncf %73 : vector<1x8x8xf32> to vector<1x8x8xbf16>
    "tpu.trace_start"() <{level = 10 : i32, message = "bqk,bkd->bqd"}> : () -> ()
    %cst_42 = arith.constant dense<0.000000e+00> : vector<1x8x8xf32>
    %78 = tpu.matmul %77, %62, %cst_42 {dimension_numbers = #tpu.dot_dimension_numbers<[2], [1], [1], [2], [0, 0, 0, 1, 1, 2], [0], [0]>} : vector<1x8x8xbf16>, vector<1x8x8xbf16>, vector<1x8x8xf32> -> vector<1x8x8xf32>
    "tpu.trace_stop"() : () -> ()
    %79 = vector.shape_cast %78 : vector<1x8x8xf32> to vector<8x8xf32>
    %80 = arith.truncf %79 : vector<8x8xf32> to vector<8x8xbf16>
    %c0_43 = arith.constant 0 : index
    %c16 = arith.constant 16 : index
    %81 = vector.load %arg7[%c0_43, %c16] : memref<8x32xbf16, #tpu.memory_space<vmem>>, vector<8x8xbf16>
    tpu.vector_store %arg7[%c0_43, %c16], %80 {strides = array<i32>} : memref<8x32xbf16, #tpu.memory_space<vmem>>, vector<8x8xbf16>,
    %82 = vector.extract_strided_slice %13 {offsets = [0, 0, 24], sizes = [1, 8, 8], strides = [1, 1, 1]} : vector<1x8x96xbf16> to vector<1x8x8xbf16>
    %83 = vector.extract_strided_slice %13 {offsets = [0, 0, 56], sizes = [1, 8, 8], strides = [1, 1, 1]} : vector<1x8x96xbf16> to vector<1x8x8xbf16>
    %84 = vector.extract_strided_slice %13 {offsets = [0, 0, 88], sizes = [1, 8, 8], strides = [1, 1, 1]} : vector<1x8x96xbf16> to vector<1x8x8xbf16>
    "tpu.trace_start"() <{level = 10 : i32, message = "bqd,bkd->bqk"}> : () -> ()
    %cst_44 = arith.constant dense<0.000000e+00> : vector<1x8x8xf32>
    %85 = tpu.matmul %82, %83, %cst_44 {dimension_numbers = #tpu.dot_dimension_numbers<[2], [2], [1], [1], [0, 0, 0, 1, 1, 1], [0], [0]>} : vector<1x8x8xbf16>, vector<1x8x8xbf16>, vector<1x8x8xf32> -> vector<1x8x8xf32>
    "tpu.trace_stop"() : () -> ()
    %cst_45 = arith.constant dense<0xFF800000> : vector<1x8xf32>
    %86 = vector.multi_reduction <maximumf>, %85, %cst_45 [2] : vector<1x8x8xf32> to vector<1x8xf32>
    %87 = vector.shape_cast %86 : vector<1x8xf32> to vector<1x8x1xf32>
    %88 = vector.broadcast %87 : vector<1x8x1xf32> to vector<1x8x8xf32>
    %89 = arith.subf %85, %88 : vector<1x8x8xf32>
    %90 = math.exp %89 : vector<1x8x8xf32>
    %cst_46 = arith.constant dense<0.000000e+00> : vector<1x8xf32>
    %91 = vector.multi_reduction <add>, %90, %cst_46 [2] : vector<1x8x8xf32> to vector<1x8xf32>
    %92 = vector.shape_cast %91 : vector<1x8xf32> to vector<1x8x1xf32>
    %93 = tpu.reciprocal %92 {approx = true} : vector<1x8x1xf32> -> vector<1x8x1xf32>
    %94 = vector.broadcast %93 : vector<1x8x1xf32> to vector<1x8x8xf32>
    %95 = arith.mulf %90, %94 : vector<1x8x8xf32>
    %c0_47 = arith.constant 0 : index
    %c0_48 = arith.constant 0 : index
    %c0_49 = arith.constant 0 : index
    %96 = vector.load %arg8[%c0_47, %c0_48, %c0_49] : memref<1x8x8xf32, #tpu.memory_space<vmem>>, vector<1x8x8xf32>
    %97 = arith.addf %96, %95 : vector<1x8x8xf32>
    %c0_50 = arith.constant 0 : index
    %c0_51 = arith.constant 0 : index
    %c0_52 = arith.constant 0 : index
    %98 = vector.load %arg8[%c0_50, %c0_51, %c0_52] : memref<1x8x8xf32, #tpu.memory_space<vmem>>, vector<1x8x8xf32>
    tpu.vector_store %arg8[%c0_50, %c0_51, %c0_52], %97 {strides = array<i32>} : memref<1x8x8xf32, #tpu.memory_space<vmem>>, vector<1x8x8xf32>,
    %99 = arith.truncf %95 : vector<1x8x8xf32> to vector<1x8x8xbf16>
    "tpu.trace_start"() <{level = 10 : i32, message = "bqk,bkd->bqd"}> : () -> ()
    %cst_53 = arith.constant dense<0.000000e+00> : vector<1x8x8xf32>
    %100 = tpu.matmul %99, %84, %cst_53 {dimension_numbers = #tpu.dot_dimension_numbers<[2], [1], [1], [2], [0, 0, 0, 1, 1, 2], [0], [0]>} : vector<1x8x8xbf16>, vector<1x8x8xbf16>, vector<1x8x8xf32> -> vector<1x8x8xf32>
    "tpu.trace_stop"() : () -> ()
    %101 = vector.shape_cast %100 : vector<1x8x8xf32> to vector<8x8xf32>
    %102 = arith.truncf %101 : vector<8x8xf32> to vector<8x8xbf16>
    %c0_54 = arith.constant 0 : index
    %c24 = arith.constant 24 : index
    %103 = vector.load %arg7[%c0_54, %c24] : memref<8x32xbf16, #tpu.memory_space<vmem>>, vector<8x8xbf16>
    tpu.vector_store %arg7[%c0_54, %c24], %102 {strides = array<i32>} : memref<8x32xbf16, #tpu.memory_space<vmem>>, vector<8x8xbf16>,
    %c0_55 = arith.constant 0 : index
    %c0_56 = arith.constant 0 : index
    %c0_57 = arith.constant 0 : index
    %104 = vector.load %arg8[%c0_55, %c0_56, %c0_57] : memref<1x8x8xf32, #tpu.memory_space<vmem>>, vector<1x8x8xf32>
    %cst_58 = arith.constant 2.500000e-01 : f32
    %105 = vector.broadcast %cst_58 : f32 to vector<1x8x8xf32>
    %106 = arith.mulf %104, %105 : vector<1x8x8xf32>
    %c0_59 = arith.constant 0 : index
    %c0_60 = arith.constant 0 : index
    %c0_61 = arith.constant 0 : index
    %107 = vector.load %arg6[%c0_59, %c0_60, %c0_61] : memref<1x8x8xf32, #tpu.memory_space<vmem>>, vector<1x8x8xf32>
    tpu.vector_store %arg6[%c0_59, %c0_60, %c0_61], %106 {strides = array<i32>} : memref<1x8x8xf32, #tpu.memory_space<vmem>>, vector<1x8x8xf32>,
    %c0_62 = arith.constant 0 : index
    %c0_63 = arith.constant 0 : index
    %108 = vector.load %arg7[%c0_62, %c0_63] : memref<8x32xbf16, #tpu.memory_space<vmem>>, vector<8x32xbf16>
    %c0_64 = arith.constant 0 : index
    %c0_65 = arith.constant 0 : index
    %109 = vector.load %arg3[%c0_64, %c0_65] : memref<32x32xbf16, #tpu.memory_space<vmem>>, vector<32x32xbf16>
    %cst_66 = arith.constant dense<0.000000e+00> : vector<8x32xf32>
    %110 = tpu.matmul %108, %109, %cst_66 {dimension_numbers = #tpu.dot_dimension_numbers<[1], [0], [0], [1], [0, 0, 1, 1], [], []>} : vector<8x32xbf16>, vector<32x32xbf16>, vector<8x32xf32> -> vector<8x32xf32>
    %111 = arith.addf %1, %110 : vector<8x32xf32>
    %112 = vector.broadcast %5 : vector<1x32xf32> to vector<8x32xf32>
    %113 = arith.addf %111, %112 : vector<8x32xf32>
    %cst_67 = arith.constant dense<0.000000e+00> : vector<8xf32>
    %114 = vector.multi_reduction <add>, %113, %cst_67 [1] : vector<8x32xf32> to vector<8xf32>
    %115 = vector.shape_cast %114 : vector<8xf32> to vector<8x1xf32>
    %cst_68 = arith.constant 3.200000e+01 : f32
    %116 = vector.broadcast %cst_68 : f32 to vector<8x1xf32>
    %117 = arith.divf %115, %116 : vector<8x1xf32>
    %118 = arith.mulf %113, %113 : vector<8x32xf32>
    %cst_69 = arith.constant dense<0.000000e+00> : vector<8xf32>
    %119 = vector.multi_reduction <add>, %118, %cst_69 [1] : vector<8x32xf32> to vector<8xf32>
    %120 = vector.shape_cast %119 : vector<8xf32> to vector<8x1xf32>
    %cst_70 = arith.constant 3.200000e+01 : f32
    %121 = vector.broadcast %cst_70 : f32 to vector<8x1xf32>
    %122 = arith.divf %120, %121 : vector<8x1xf32>
    %123 = arith.mulf %117, %117 : vector<8x1xf32>
    %124 = arith.subf %122, %123 : vector<8x1xf32>
    %125 = vector.broadcast %117 : vector<8x1xf32> to vector<8x32xf32>
    %126 = arith.subf %113, %125 : vector<8x32xf32>
    %cst_71 = arith.constant 9.99999974E-6 : f32
    %127 = vector.broadcast %cst_71 : f32 to vector<8x1xf32>
    %128 = arith.addf %124, %127 : vector<8x1xf32>
    %129 = math.rsqrt %128 : vector<8x1xf32>
    %130 = vector.broadcast %129 : vector<8x1xf32> to vector<8x32xf32>
    %131 = arith.mulf %126, %130 : vector<8x32xf32>
    %132 = vector.broadcast %6 : vector<1x32xf32> to vector<8x32xf32>
    %133 = arith.mulf %131, %132 : vector<8x32xf32>
    %134 = vector.broadcast %7 : vector<1x32xf32> to vector<8x32xf32>
    %135 = arith.addf %133, %134 : vector<8x32xf32>
    %136 = vector.shape_cast %135 : vector<8x32xf32> to vector<1x8x32xf32>
    %c0_72 = arith.constant 0 : index
    %c0_73 = arith.constant 0 : index
    %c0_74 = arith.constant 0 : index
    %137 = vector.load %arg5[%c0_72, %c0_73, %c0_74] : memref<1x8x32xf32, #tpu.memory_space<vmem>>, vector<1x8x32xf32>
    tpu.vector_store %arg5[%c0_72, %c0_73, %c0_74], %136 {strides = array<i32>} : memref<1x8x32xf32, #tpu.memory_space<vmem>>, vector<1x8x32xf32>,
    return
  }
  func.func @transform_0(%arg0: i32) -> (i32, i32, i32) {
    %c0_i32 = arith.constant 0 : i32
    %c0_i32_0 = arith.constant 0 : i32
    %c0_i32_1 = arith.constant 0 : i32
    return %arg0, %c0_i32, %c0_i32_0 : i32, i32, i32
  }
  func.func @transform_1(%arg0: i32) -> (i32, i32) {
    %c0_i32 = arith.constant 0 : i32
    %c0_i32_0 = arith.constant 0 : i32
    %c0_i32_1 = arith.constant 0 : i32
    return %c0_i32, %c0_i32_0 : i32, i32
  }
  func.func @transform_2(%arg0: i32) -> (i32, i32) {
    %c0_i32 = arith.constant 0 : i32
    %c0_i32_0 = arith.constant 0 : i32
    %c0_i32_1 = arith.constant 0 : i32
    return %c0_i32, %c0_i32_0 : i32, i32
  }
  func.func @transform_3(%arg0: i32) -> (i32, i32) {
    %c0_i32 = arith.constant 0 : i32
    %c0_i32_0 = arith.constant 0 : i32
    %c0_i32_1 = arith.constant 0 : i32
    return %c0_i32, %c0_i32_0 : i32, i32
  }
  func.func @transform_4(%arg0: i32) -> (i32, i32, i32) {
    %c0_i32 = arith.constant 0 : i32
    %c0_i32_0 = arith.constant 0 : i32
    %c0_i32_1 = arith.constant 0 : i32
    return %arg0, %c0_i32, %c0_i32_0 : i32, i32, i32
  }
  func.func @transform_5(%arg0: i32) -> (i32, i32, i32) {
    %c0_i32 = arith.constant 0 : i32
    %c0_i32_0 = arith.constant 0 : i32
    %c0_i32_1 = arith.constant 0 : i32
    return %arg0, %c0_i32, %c0_i32_0 : i32, i32, i32
  }
}

</mosaic_0001>

<bundles_post_ra>
// kernel: tpu_custom_call.1
= control target key start
LH: loop header
LB: loop body
LE: loop exit
PB: predicated region body
PF: predicated region fallthrough
CT: control target
= control target key end

     0   :  { %11 = vsyncpa [#allocation5], 0  ;;  %s1923_s0 = inlined_call_operand.hbm [shape: f32[2,8,32], index: 0, kind: input, shape index: {}]   ;;  %s1924_s1 = inlined_call_operand.hbm [shape: bf16[32,96], index: 1, kind: input, shape index: {}]   ;;  %s1925_s2 = inlined_call_operand.hbm [shape: bf16[32,32], index: 2, kind: input, shape index: {}]   ;;  %s1926_s3 = inlined_call_operand.hbm [shape: f32[8,96], index: 3, kind: input, shape index: {}]   ;;  %s1927_s4 = inlined_call_operand.hbm [shape: f32[2,8,32], index: 4, kind: output, shape index: {0}]   ;;  %s1928_s5 = inlined_call_operand.hbm [shape: f32[2,8,8], index: 5, kind: output, shape index: {1}]  }
   0x1   :  { %13 = vsyncpa [#allocation5 + $0x1], 0 }
   0x2   :  { %14 = vsyncpa [#allocation8], 0 }
   0x3   :  { %15 = vsyncpa [#allocation11], 0 }
   0x4   :  { %16 = vsyncpa [#allocation6], 0 }
   0x5   :  { %18 = vsyncpa [#allocation6 + $0x1], 0 }
   0x6   :  { %19 = vsyncpa [#allocation14], 0 }
   0x7   :  { %21 = vsyncpa [#allocation14 + $0x1], 0  ;;  %s1618_s18 = smov 0   ;;  %s1620_s19 = smov 0  }
   0x8   :  { %s1622_s20 = smov 0   ;;  %s1624_s21 = smov 0  }
   0x9 LB: > { %s1639_s22 = sadd.s32 4294967295, %s1562_s21   ;;  %s1105_s23 = sadd.s32 4294967294, %s1562_s21   ;;  %s1562_s21 = sphi %s1624_s21, %s1952_s21   ;;  %s1558_s20 = sphi %s1622_s20, %s1951_s20   ;;  %s1554_s19 = sphi %s1620_s19, %s1950_s19   ;;  %s1550_s18 = sphi %s1618_s18, %s1949_s18  }
   0xa   : > { %p47_p0 = scmp.ne.s32.totalorder %s1554_s19, %s1550_s18  ;;  %p1929_p1 = scmp.eq.s32.totalorder %s1639_s22, 0 }
   0xb   : > { %p140_p3 = scmp.eq.s32.totalorder %s1105_s23, 1  ;;  %p1106_p5 = scmp.ge.s32.totalorder %s1562_s21, 1 }
   0xc   : > { %p1648_p4 = por %p1929_p1, %p47_p0  ;;  %p173_p7 = scmp.lt.s32.totalorder %s1562_s21, 3 }
   0xd   : > { %p1653_p6 = por %p140_p3, %p47_p0  ;;  %s1564_s27 = smov [#allocation7]  }
   0xe   : > { %s1933_s24 = scalar_select %p1648_p4, 1, 0 }
   0xf   : > { %s1934_s25 = scalar_select %p1653_p6, 1, 0 }
  0x10   : > { %p1658_p8 = pnand %p1106_p5, %p173_p7  ;;  %s185_s28 = sshll.u32 %s1564_s27, 4  ;;  %s186_s28 = int_to_ptr.vmem [resolvable:$true] %s185_s28 }
  0x11   : > { %s1565_s30 = smov [#allocation9]   ;;  %s1566_s7 = smov [#allocation10]  }
  0x12   : > { %s1935_s26 = scalar_select %p1658_p8, 1, 0 }
  0x13   : > { %p1250_p9 = pneg %p1658_p8  ;;  %s198_s6 = sshll.u32 %s1565_s30, 4  ;;  %s199_s6 = int_to_ptr.vmem [resolvable:$true] %s198_s6 }
  0x14   : > { %s212_s8 = sshll.u32 %s1566_s7, 4  ;;  %s1365_s9 = scalar_lea.vmem %s186_s28, 256  ;;  %s213_s8 = int_to_ptr.vmem [resolvable:$true] %s212_s8 }
  0x15   : > { %p1667_p11 = pnand %p1250_p9, %p1929_p1  ;;  %p1366_p13 = scmp.ne.s32.totalorder %s186_s28, %s1365_s9 }
  0x16   : > { %p1373_p5 = scmp.lt.s32.totalorder %s186_s28, %s186_s28  ;;  %p1374_p7 = scmp.lt.s32.totalorder %s1365_s9, %s1365_s9 }
  0x17   : > { %p1356_p12 = pneg %p1667_p11 }
  0x18   : > { %p1375_p9 = por %p1374_p7, %p1373_p5 }
  0x19   : > { %p1368_p0 = pnand %p1366_p13, %p1356_p12 }
  0x1b   : > { %p1369_p3 = pneg %p1368_p0 }
  0x1d   : > { %p1376_p10 = pnand %p1375_p9, %p1369_p3 }
  0x1f   : > { %1379 = shalt.err (!%p1376_p10)
}
  0x20   : > { %s1567_s10 = smov 64   ;;  %s1568_s11 = smov 4  }
  0x21   : > { %1253 = dma.hbm_to_vmem [thread:$0]  (!%p1667_p11), %s1924_s1, 256, %s186_s28, [#allocation8], %s1567_s10, %s1567_s10, %s1568_s11  }
  0x22   : > { %s1391_s14 = scalar_lea.vmem %s199_s6, 256  ;;  %p1399_p2 = scmp.lt.s32.totalorder %s199_s6, %s199_s6 }
  0x23   : > { %p1392_p1 = scmp.ne.s32.totalorder %s199_s6, %s1391_s14  ;;  %p1400_p6 = scmp.lt.s32.totalorder %s1391_s14, %s1391_s14 }
  0x25   : > { %p1394_p13 = pnand %p1392_p1, %p1356_p12  ;;  %p1401_p5 = por %p1400_p6, %p1399_p2 }
  0x27   : > { %p1395_p0 = pneg %p1394_p13 }
  0x29   : > { %p1402_p3 = pnand %p1401_p5, %p1395_p0 }
  0x2b   : > { %1405 = shalt.err (!%p1402_p3)
}
  0x2c   : > { %1256 = dma.hbm_to_vmem [thread:$0]  (!%p1667_p11), %s1925_s2, 256, %s199_s6, [#allocation8], %s1567_s10, %s1567_s10, %s1568_s11  }
  0x2d   : > { %s1417_s17 = scalar_lea.vmem %s213_s8, 128  ;;  %p1425_p9 = scmp.lt.s32.totalorder %s213_s8, %s213_s8 }
  0x2e   : > { %p1418_p10 = scmp.ne.s32.totalorder %s213_s8, %s1417_s17  ;;  %p1426_p13 = scmp.lt.s32.totalorder %s1417_s17, %s1417_s17 }
  0x30   : > { %p1420_p7 = pnand %p1418_p10, %p1356_p12  ;;  %p1427_p4 = por %p1426_p13, %p1425_p9 }
  0x32   : > { %p1421_p1 = pneg %p1420_p7 }
  0x34   : > { %p1428_p2 = pnand %p1427_p4, %p1421_p1 }
  0x36   : > { %1431 = shalt.err (!%p1428_p2)
}
  0x37   : > { %1259 = dma.hbm_to_vmem [thread:$0]  (!%p1667_p11), %s1926_s3, 128, %s213_s8, [#allocation11]  }
  0x38   : > { %s1698_s28 = sadd.s32 1, %s1562_s21   ;;  %s34_s29 = sadd.s32 1, %s1558_s20 }
  0x39   : > { %s31_s30 = ssub.s32 %s1562_s21, %s1698_s28  ;;  %p41_p6 = scmp.ne.s32.totalorder %s1558_s20, %s1554_s19 }
  0x3a   : > { %p32_p4 = scmp.eq.s32.totalorder %s31_s30, 0  ;;  %p42_p12 = scmp.eq.s32.totalorder %s1562_s21, 0 }
  0x3b   : > { %p1274_p0 = scmp.lt.s32.totalorder %s1562_s21, 2  ;;  %p1937_p3 = scmp.eq.s32.totalorder %s1639_s22, 1 }
  0x3c   : > { %s1708_s6 = scalar_select %p32_p4, %s1558_s20, %s34_s29  }
  0x3d   : > { %p43_p5 = por %p42_p12, %p41_p6  ;;  %p1712_p10 = por %p1937_p3, %p41_p6 }
  0x3e   : > { %s223_s9 = sand.u32 1, %s1558_s20   ;;  %s1112_s10 = sshll.u32 %s1562_s21, 7 }
  0x3f   : > { %s1938_s7 = scalar_select %p1712_p10, 1, 0 }
  0x40   : > { %s1111_s8 = sshll.u32 %s223_s9, 3  ;;  %s1721_s13 = scalar_lea.hbm %s1923_s0, %s1112_s10 }
  0x41   : > { %s227_s14 = scalar_lea.vmem [#allocation4], %s1111_s8  ;;  %p1723_p11 = pnand %p1274_p0, %p43_p5 }
  0x42   : > { %s234_s15 = sshll.u32 %s227_s14, 4  ;;  %s224_s17 = scalar_lea.sflag [#allocation5], %s223_s9  ;;  %s235_s15 = int_to_ptr.vmem [resolvable:$true] %s234_s15 }
  0x43   : > { %s1432_s23 = scalar_lea.hbm %s1721_s13, 128  ;;  %p1434_p1 = pneg %p1723_p11 }
  0x44   : > { %p1433_p7 = scmp.ne.s32.totalorder %s1721_s13, %s1432_s23  ;;  %s1437_s29 = scalar_lea.hbm %s1923_s0, 256 }
  0x45   : > { %p1438_p2 = scmp.lt.s32.totalorder %s1721_s13, %s1923_s0  ;;  %p1439_p4 = scmp.lt.s32.totalorder %s1437_s29, %s1432_s23 }
  0x46   : > { %p1435_p9 = pnand %p1434_p1, %p1433_p7 }
  0x47   : > { %p1440_p6 = por %p1439_p4, %p1438_p2 }
  0x48   : > { %p1436_p13 = pneg %p1435_p9 }
  0x4a   : > { %p1441_p12 = pnand %p1440_p6, %p1436_p13 }
  0x4c   : > { %1444 = shalt.err (!%p1441_p12)
}
  0x4d   : > { %s1445_s11 = scalar_lea.vmem %s235_s15, 128  ;;  %s1569_s9 = smov [#allocation4]  }
  0x4e   : > { %p1446_p0 = scmp.ne.s32.totalorder %s235_s15, %s1445_s11  ;;  %s1450_s12 = sshll.u32 %s1569_s9, 4  ;;  %s1451_s12 = int_to_ptr.vmem [resolvable:$false] %s1450_s12 }
  0x4f   : > { %s1452_s14 = scalar_lea.vmem %s1451_s12, 256  ;;  %p1453_p7 = scmp.lt.s32.totalorder %s235_s15, %s1451_s12 }
  0x50   : > { %p1448_p5 = pnand %p1446_p0, %p1434_p1  ;;  %p1454_p9 = scmp.lt.s32.totalorder %s1452_s14, %s1445_s11 }
  0x52   : > { %p1449_p3 = pneg %p1448_p5  ;;  %p1455_p10 = por %p1454_p9, %p1453_p7 }
  0x54   : > { %p1456_p8 = pnand %p1455_p10, %p1449_p3 }
  0x56   : > { %1459 = shalt.err (!%p1456_p8)
}
  0x57   : > { %1263 = dma.hbm_to_vmem [thread:$0]  (!%p1723_p11), %s1721_s13, 128, %s235_s15, %s224_s17  }
  0x58   : > { %p1940_p13 = scmp.ne.s32.totalorder %s1935_s26, 0 }
  0x59   : > { %s1744_s23 = sand.u32 (!%p1940_p13), 1, %s1554_s19   ;;  %p1941_p10 = scmp.ne.s32.totalorder (!%p1940_p13), %s1933_s24, 0 }
  0x5a   : > { %243 = sbr.rel (%p1940_p13) target bundleno = 1695 (0x69f), region = 36  ;;  %s1747_s27 = sshll.u32 (!%p1940_p13), %s1744_s23, 3 }
  0x5b   : > { %s246_s30 = scalar_lea.sflag (!%p1940_p13), [#allocation5], %s1744_s23  ;;  %s249_s29 = scalar_lea.vmem (!%p1940_p13), [#allocation4], %s1747_s27 }
  0x5f   : > { %1529 = dma.done.wait (%p1941_p10), %s246_s30, 128  }
  0x60   : > { %1531 = vsyncadd (%p1941_p10), %s246_s30, 4294967168  ;;  %p1942_p8 = scmp.eq.s32.totalorder %s1639_s22, 0 }
  0x62   : > { %1533 = dma.done.wait (%p1942_p8), [#allocation8], 512   ;;  %p1943_p11 = pmov %p1942_p8 }
  0x63   : > { %p1944_p1 = pmov %p1942_p8 }
  0x64   : > { %1535 = vsyncadd (%p1943_p11), [#allocation8], 4294966784 }
  0x65   : > { %1537 = dma.done.wait (%p1944_p1), [#allocation11], 128   ;;  %p1945_p2 = pmov %p1944_p1 }
  0x66   : > { %v1570_v0 = vmov 0.0   ;;  %vm1571_vm0 = vmmov 0   ;;  %v1332_v1 = vld [vmem:[#allocation7 + $0x8] sm:$0xff]   ;;  %v1333_v2 = vld [vmem:[#allocation7] sm:$0xff]   ;;  %v1769_v3 = vld [vmem:[%s249_s29] sm:$0xff]  ;;  %vm317_vm1 = vcmask 261120   ;;  %v301_v5 = vlaneseq }
  0x67   : > { %1539 = vsyncadd (%p1945_p2), [#allocation11], 4294967168  ;;  %1168 = vmatprep.subr.bf16.mxu0 %v1570_v0  ;;  %1172 = vmatprep.mubr.msk.bf16.mxu0 %vm1571_vm0, %v1570_v0  ;;  %v295_v4 = vpack.c.bf16 %v1769_v3, %v1769_v3  ;;  %vm362_vm2 = vcmask 64512   ;;  %v1783_v8 = vld [vmem:[#allocation10] sm:$0xff]  ;;  %s1572_s24 = smov 120   ;;  %s1573_s26 = smov 96  }
  0x68   : > { %1176 = vmatprep.subr.bf16.mxu1 %v1570_v0  ;;  %1178 = vmatprep.mubr.msk.bf16.mxu1 %vm1571_vm0, %v1570_v0  ;;  %v1778_v6 = vshrl.u32 %v301_v5, 7  ;;  %363 = vst.msk [vmem:[#allocation3] sm:$0xff] %vm362_vm2, %v1570_v0  ;;  %s1574_s13 = smov 80   ;;  %s1575_s15 = smov 88   ;;  %vm433_vm3 = vcmask 1043456   ;;  %vm478_vm4 = vcmask 60416  }
  0x69   : > { %1169 = vmatpush3.bf16.msra.mxu0 %v1332_v1  ;;  %s1576_s16 = smov 72   ;;  %s1577_s17 = smov 112   ;;  %vm600_vm5 = vcmask 126016   ;;  %vm722_vm6 = vcmask 191616   ;;  %vm844_vm7 = vcmask 257216  }
  0x6a   : > { %1170 = vmatprep.subr.bf16.mxu0 %v1570_v0  ;;  %v303_v7 = vsub.s32 0, %v1778_v6  ;;  %s1578_s10 = smov 104   ;;  %s1579_s8 = smov 56  }
  0x6b   : > { %s1580_s11 = smov 64   ;;  %s1581_s9 = smov 40  }
  0x6c   : > { %v304_v9 = vrot.slane %v1783_v8, %v303_v7  ;;  %s1582_s12 = smov 48   ;;  %s292_s14 = scalar_lea.vmem [#allocation13], %s1747_s27 }
  0x6d   : > { %1171 = vmatpush3.bf16.msra.mxu0 %v1333_v2  ;;  %s1583_s30 = smov 8   ;;  %s1584_s29 = smov 16  }
  0x6e   : > { %1182 = vmatprep.subr.bf16.mxu0 %v1570_v0  ;;  %p1946_p6 = scmp.ne.s32.totalorder %s1938_s7, 0 }
  0x70   : > { %1173 = vmatmul.mubr.msk.bf16.vlgmr.msra.gmra.mxu0 %vm317_vm1, %v295_v4 }
  0x71   : > { %1184 = vmatprep.mubr.msk.bf16.mxu0 %vm1571_vm0, %v1570_v0 }
 0x130   : > { %v355_v10 = vpop.f32.mrf.mxu0 }
 0x131   : > { %v356_v11 = vadd.f32 %v355_v10, %v304_v9  ;;  %v424_v10 = vld [vmem:[#allocation3] sm:$0xff] }
 0x132   : > { %v1174_v12 = vpop.f32.mrf.mxu0 }
 0x133   : > { %v1786_v13 = vpack.c.bf16 %v356_v11, %v356_v11 }
 0x134   : > { %v358_v14 = vpop.f32.mrf.mxu0 }
 0x135   : > { %480 = vrot.lane.b32.xlu1 %v1786_v13, %s1572_s24  ;;  %365 = vrot.lane.b32.xlu0 %v1786_v13, %s1573_s26  ;;  %s1585_s24 = smov 24   ;;  %s1139_s26 = sshll.u32 %s1639_s22, 7 }
 0x136   : > { %v1175_v15 = vpop.f32.mrf.mxu0 }
 0x139   : > { %604 = vrot.lane.b32.xlu1 %v1786_v13, %s1574_s13  ;;  %482 = vrot.lane.b32.xlu0 %v1786_v13, %s1575_s15 }
 0x13d   : > { %726 = vrot.lane.b32.xlu1 %v1786_v13, %s1576_s16  ;;  %602 = vrot.lane.b32.xlu0 %v1786_v13, %s1577_s17  ;;  %s972_s16 = scalar_lea.hbm %s1928_s5, %s1139_s26  ;;  %s974_s17 = sshll.u32 %s292_s14, 4  ;;  %s975_s17 = int_to_ptr.vmem [resolvable:$true] %s974_s17 }
 0x141   : > { %724 = vrot.lane.b32.xlu0 %v1786_v13, %s1578_s10  ;;  %s948_s10 = scalar_lea.sflag [#allocation14], %s1744_s23 }
 0x1a7   : > { %v366_v16 = vpop.permute.xlu0 %365  ;;  %v481_v19 = vpop.permute.xlu1 %480 }
 0x1a8   : > { %v371_v17 = vsel %vm362_vm2, %v366_v16, 0 }
 0x1a9   : > { %1177 = vmatpush3.bf16.xpose.msra.mxu1 %v371_v17 }
 0x1aa   : > { %1188 = vmatprep.subr.bf16.mxu1 %v1570_v0 }
 0x1ab   : > { %v483_v18 = vpop.permute.xlu0 %482  ;;  %v605_v21 = vpop.permute.xlu1 %604 }
 0x1ac   : > { %v488_v20 = vsel %vm362_vm2, %v483_v18, 0  ;;  %v610_v22 = vsel %vm362_vm2, %v605_v21, 0 }
 0x1af   : > { %v727_v23 = vpop.permute.xlu1 %726  ;;  %v603_v24 = vpop.permute.xlu0 %602 }
 0x1b0   : > { %1179 = vmatmul.mubr.msk.bf16.vlgmr.msra.gmra.mxu1 %vm362_vm2, %v1786_v13  ;;  %v732_v25 = vsel %vm362_vm2, %v727_v23, 0 }
 0x1b1   : > { %1189 = vmatpush3.bf16.xpose.msra.mxu1 %v488_v20  ;;  %1190 = vmatprep.mubr.msk.bf16.mxu1 %vm1571_vm0, %v1570_v0 }
 0x1b2   : > { %1200 = vmatprep.subr.bf16.mxu1 %v1570_v0 }
 0x1b3   : > { %v725_v26 = vpop.permute.xlu0 %724 }
 0x1b8   : > { %1191 = vmatmul.mubr.msk.bf16.vlgmr.msra.gmra.mxu1 %vm362_vm2, %v481_v19 }
 0x1b9   : > { %1201 = vmatpush3.bf16.xpose.msra.mxu1 %v610_v22  ;;  %1202 = vmatprep.mubr.msk.bf16.mxu1 %vm1571_vm0, %v1570_v0 }
 0x1ba   : > { %1212 = vmatprep.subr.bf16.mxu1 %v1570_v0 }
 0x1c0   : > { %1203 = vmatmul.mubr.msk.bf16.vlgmr.msra.gmra.mxu1 %vm362_vm2, %v603_v24 }
 0x1c1   : > { %1213 = vmatpush3.bf16.xpose.msra.mxu1 %v732_v25  ;;  %1214 = vmatprep.mubr.msk.bf16.mxu1 %vm1571_vm0, %v1570_v0 }
 0x1c2   : > { %1224 = vmatprep.subr.bf16.mxu1 %v1570_v0 }
 0x1c8   : > { %1215 = vmatmul.mubr.msk.bf16.vlgmr.msra.gmra.mxu1 %vm362_vm2, %v725_v26 }
 0x1c9   : > { %1228 = vmatprep.mubr.msk.bf16.mxu1 %vm1571_vm0, %v1570_v0 }
 0x270   : > { %v407_v27 = vpop.f32.mrf.mxu1 }
 0x271   : > { %v413_v28 = vsel %vm362_vm2, %v407_v27, -inf }
 0x272   : > { %414 = vmax.xlane.f32.xlu1 %v413_v28  ;;  %v1180_v29 = vpop.f32.mrf.mxu1 }
 0x274   : > { %v410_v30 = vpop.f32.mrf.mxu1 }
 0x276   : > { %v1181_v31 = vpop.f32.mrf.mxu1 }
 0x278   : > { %v524_v32 = vpop.f32.mrf.mxu1 }
 0x279   : > { %v530_v33 = vsel %vm362_vm2, %v524_v32, -inf }
 0x27a   : > { %531 = vmax.xlane.f32.xlu0 %v530_v33  ;;  %v1192_v34 = vpop.f32.mrf.mxu1 }
 0x27c   : > { %v527_v35 = vpop.f32.mrf.mxu1 }
 0x27e   : > { %v1193_v36 = vpop.f32.mrf.mxu1 }
 0x280   : > { %v646_v37 = vpop.f32.mrf.mxu1 }
 0x281   : > { %v652_v38 = vsel %vm362_vm2, %v646_v37, -inf }
 0x282   : > { %653 = vmax.xlane.f32.xlu0 %v652_v38  ;;  %v1204_v39 = vpop.f32.mrf.mxu1 }
 0x284   : > { %v649_v40 = vpop.f32.mrf.mxu1 }
 0x286   : > { %v1205_v41 = vpop.f32.mrf.mxu1 }
 0x288   : > { %v768_v42 = vpop.f32.mrf.mxu1 }
 0x289   : > { %v774_v43 = vsel %vm362_vm2, %v768_v42, -inf }
 0x28a   : > { %775 = vmax.xlane.f32.xlu1 %v774_v43  ;;  %v1216_v44 = vpop.f32.mrf.mxu1 }
 0x28c   : > { %v771_v45 = vpop.f32.mrf.mxu1 }
 0x28e   : > { %v1217_v46 = vpop.f32.mrf.mxu1 }
 0x2fb   : > { %v415_v47 = vpop.xlane.xlu1 %414 }
 0x2fc   : > { %v416_v48 = vsub.f32 %v407_v27, %v415_v47 }
 0x2fe   : > { %v417_v49 = vmul.f32 1.442695, %v416_v48 }
 0x300   : > { %1336 = vpow2.f32 %v417_v49 }
 0x303   : > { %v532_v50 = vpop.xlane.xlu0 %531 }
 0x304   : > { %v533_v51 = vsub.f32 %v524_v32, %v532_v50 }
 0x306   : > { %v534_v52 = vmul.f32 1.442695, %v533_v51  ;;  %v1334_v51 = vld [vmem:[#allocation9 + $0x8] sm:$0xff]  }
 0x307   : > { %1225 = vmatpush3.bf16.msra.mxu1 %v1334_v51 }
 0x308   : > { %1338 = vpow2.f32 %v534_v52  ;;  %1226 = vmatprep.subr.bf16.mxu1 %v1570_v0 }
 0x30b   : > { %v654_v53 = vpop.xlane.xlu0 %653 }
 0x30c   : > { %v655_v54 = vsub.f32 %v646_v37, %v654_v53 }
 0x30d   : > { %v1337_v55 = vpop.eup %1336 }
 0x30e   : > { %v656_v56 = vmul.f32 1.442695, %v655_v54  ;;  %v419_v57 = vsel %vm362_vm2, %v1337_v55, 0.0  ;;  %v1335_v54 = vld [vmem:[#allocation9] sm:$0xff]  }
 0x30f   : > { %420 = vadd.xlane.f32.xlu0 %v419_v57  ;;  %1227 = vmatpush3.bf16.msra.mxu1 %v1335_v54 }
 0x310   : > { %1340 = vpow2.f32 %v656_v56 }
 0x313   : > { %v776_v62 = vpop.xlane.xlu1 %775 }
 0x314   : > { %v777_v63 = vsub.f32 %v768_v42, %v776_v62 }
 0x315   : > { %v1339_v58 = vpop.eup %1338 }
 0x316   : > { %v536_v59 = vsel %vm362_vm2, %v1339_v58, 0.0  ;;  %v778_v1 = vmul.f32 1.442695, %v777_v63 }
 0x317   : > { %537 = vadd.xlane.f32.xlu1 %v536_v59 }
 0x318   : > { %1342 = vpow2.f32 %v778_v1 }
 0x31d   : > { %v1341_v60 = vpop.eup %1340 }
 0x31e   : > { %v658_v61 = vsel %vm362_vm2, %v1341_v60, 0.0 }
 0x31f   : > { %659 = vadd.xlane.f32.xlu0 %v658_v61 }
 0x325   : > { %v1343_v2 = vpop.eup %1342 }
 0x326   : > { %v780_v4 = vsel %vm362_vm2, %v1343_v2, 0.0 }
 0x328   : > { %545 = vrot.lane.b32.xlu1 %v1786_v13, %s1579_s8  ;;  %s1460_s8 = scalar_lea.vmem %s975_s17, 128 }
 0x329   : > { %p1461_p4 = scmp.ne.s32.totalorder %s975_s17, %s1460_s8 }
 0x32b   : > { %p1462_p12 = pnand %p1461_p4, %p1946_p6 }
 0x32d   : > { %p1463_p0 = pneg %p1462_p12 }
 0x335   : > { %428 = vrot.lane.b32.xlu0 %v1786_v13, %s1580_s11  ;;  %s1586_s11 = smov [#allocation13]  }
 0x339   : > { %789 = vrot.lane.b32.xlu0 %v1786_v13, %s1581_s9  ;;  %s1464_s9 = sshll.u32 %s1586_s11, 4  ;;  %s1465_s9 = int_to_ptr.vmem [resolvable:$false] %s1464_s9 }
 0x33a   : > { %p1467_p5 = scmp.lt.s32.totalorder %s975_s17, %s1465_s9 }
 0x34c   : > { %781 = vadd.xlane.f32.xlu1 %v780_v4  ;;  %v912_v4 = vsub.s32 1, %v1778_v6 }
 0x35d   : > { %667 = vrot.lane.b32.xlu1 %v1786_v13, %s1582_s12  ;;  %s1466_s12 = scalar_lea.vmem %s1465_s9, 256 }
 0x35e   : > { %p1468_p3 = scmp.lt.s32.totalorder %s1466_s12, %s1460_s8 }
 0x360   : > { %p1469_p7 = por %p1468_p3, %p1467_p5 }
 0x362   : > { %p1470_p9 = pnand %p1469_p7, %p1463_p0 }
 0x398   : > { %v421_v5 = vpop.xlane.xlu0 %420 }
 0x399   : > { %1344 = vrcp.f32 %v421_v5  ;;  %v913_v5 = vrot.slane %v1783_v8, %v912_v4 }
 0x3a0   : > { %v538_v7 = vpop.xlane.xlu1 %537 }
 0x3a1   : > { %1346 = vrcp.f32 %v538_v7 }
 0x3a4   : > { %v546_v18 = vpop.permute.xlu1 %545 }
 0x3a5   : > { %v551_v19 = vsel %vm433_vm3, %v546_v18, 0 }
 0x3a6   : > { %v1345_v9 = vpop.eup %1344 }
 0x3a7   : > { %v423_v11 = vmul.f32 %v1345_v9, %v1337_v55 }
 0x3a8   : > { %v660_v12 = vpop.xlane.xlu0 %659 }
 0x3a9   : > { %v425_v14 = vadd.f32 %v424_v10, %v423_v11  ;;  %1348 = vrcp.f32 %v660_v12  ;;  %v427_v13 = vpack.c.bf16 %v423_v11, %v423_v11 }
 0x3ab   : > { %426 = vst.msk [vmem:[#allocation3] sm:$0xff] %vm362_vm2, %v425_v14 }
 0x3ac   : > { %v429_v15 = vpop.permute.xlu0 %428 }
 0x3ad   : > { %v435_v16 = vsel %vm433_vm3, %v429_v15, 0 }
 0x3ae   : > { %v1347_v17 = vpop.eup %1346  ;;  %1183 = vmatpush3.bf16.msra.mxu0 %v435_v16 }
 0x3af   : > { %1194 = vmatprep.subr.bf16.mxu0 %v1570_v0  ;;  %v540_v20 = vmul.f32 %v1347_v17, %v1339_v58 }
 0x3b0   : > { %v790_v31 = vpop.permute.xlu0 %789 }
 0x3b1   : > { %1185 = vmatmul.mubr.msk.bf16.vlgmr.msra.gmra.mxu0 %vm362_vm2, %v427_v13  ;;  %v544_v23 = vpack.c.bf16 %v540_v20, %v540_v20  ;;  %v795_v33 = vsel %vm433_vm3, %v790_v31, 0 }
 0x3b2   : > { %1195 = vmatpush3.bf16.msra.mxu0 %v551_v19  ;;  %1196 = vmatprep.mubr.msk.bf16.mxu0 %vm1571_vm0, %v1570_v0  ;;  %v541_v21 = vld [vmem:[#allocation3] sm:$0xff] }
 0x3b3   : > { %v542_v22 = vadd.f32 %v541_v21, %v540_v20  ;;  %1206 = vmatprep.subr.bf16.mxu0 %v1570_v0 }
 0x3b5   : > { %543 = vst.msk [vmem:[#allocation3] sm:$0xff] %vm362_vm2, %v542_v22 }
 0x3b6   : > { %v1349_v24 = vpop.eup %1348 }
 0x3b7   : > { %v662_v25 = vmul.f32 %v1349_v24, %v1341_v60 }
 0x3b9   : > { %1197 = vmatmul.mubr.msk.bf16.vlgmr.msra.gmra.mxu0 %vm362_vm2, %v544_v23  ;;  %v666_v32 = vpack.c.bf16 %v662_v25, %v662_v25 }
 0x3ba   : > { %1208 = vmatprep.mubr.msk.bf16.mxu0 %vm1571_vm0, %v1570_v0 }
 0x3bc   : > { %v663_v26 = vld [vmem:[#allocation3] sm:$0xff] }
 0x3bd   : > { %v664_v27 = vadd.f32 %v663_v26, %v662_v25 }
 0x3bf   : > { %665 = vst.msk [vmem:[#allocation3] sm:$0xff] %vm362_vm2, %v664_v27 }
 0x3c6   : > { %v785_v36 = vld [vmem:[#allocation3] sm:$0xff] }
 0x3d5   : > { %v782_v28 = vpop.xlane.xlu1 %781 }
 0x3d6   : > { %1350 = vrcp.f32 %v782_v28 }
 0x3d9   : > { %v668_v29 = vpop.permute.xlu1 %667 }
 0x3da   : > { %v673_v30 = vsel %vm433_vm3, %v668_v29, 0 }
 0x3db   : > { %1207 = vmatpush3.bf16.msra.mxu0 %v673_v30 }
 0x3dc   : > { %1218 = vmatprep.subr.bf16.mxu0 %v1570_v0 }
 0x3de   : > { %1209 = vmatmul.mubr.msk.bf16.vlgmr.msra.gmra.mxu0 %vm362_vm2, %v666_v32 }
 0x3df   : > { %1219 = vmatpush3.bf16.msra.mxu0 %v795_v33  ;;  %1220 = vmatprep.mubr.msk.bf16.mxu0 %vm1571_vm0, %v1570_v0 }
 0x3e3   : > { %v1351_v34 = vpop.eup %1350 }
 0x3e4   : > { %v784_v35 = vmul.f32 %v1351_v34, %v1343_v2 }
 0x3e6   : > { %v786_v37 = vadd.f32 %v785_v36, %v784_v35  ;;  %v788_v38 = vpack.c.bf16 %v784_v35, %v784_v35 }
 0x3e8   : > { %787 = vst.msk [vmem:[#allocation3] sm:$0xff] %vm362_vm2, %v786_v37  ;;  %1221 = vmatmul.mubr.msk.bf16.vlgmr.msra.gmra.mxu0 %vm362_vm2, %v788_v38 }
 0x3ef   : > { %v846_v39 = vld [vmem:[#allocation3] sm:$0xff] }
 0x3f0   : > { %v847_v40 = vmul.f32 0.25, %v846_v39 }
 0x3f2   : > { %848 = vst.msk [vmem:[%s292_s14] sm:$0xff] %vm362_vm2, %v847_v40 }
 0x471   : > { %v471_v41 = vpop.f32.mrf.mxu0 }
 0x472   : > { %v477_v42 = vpack.c.bf16 %v471_v41, %v471_v41 }
 0x473   : > { %v1186_v43 = vpop.f32.mrf.mxu0 }
 0x474   : > { %479 = vst.msk [vmem:[#allocation2] sm:$0xf] %vm478_vm4, %v477_v42 }
 0x475   : > { %v474_v44 = vpop.f32.mrf.mxu0 }
 0x477   : > { %v1187_v45 = vpop.f32.mrf.mxu0 }
 0x479   : > { %v587_v46 = vpop.f32.mrf.mxu0 }
 0x47a   : > { %v1143_v47 = vpack.c.bf16 %v587_v46, %v587_v46 }
 0x47b   : > { %v1198_v48 = vpop.f32.mrf.mxu0 }
 0x47c   : > { %597 = vrot.lane.b32.xlu1 %v1143_v47, %s1583_s30 }
 0x47d   : > { %v590_v49 = vpop.f32.mrf.mxu0 }
 0x47f   : > { %v1199_v50 = vpop.f32.mrf.mxu0 }
 0x49e   : > { %v709_v52 = vpop.f32.mrf.mxu0 }
 0x49f   : > { %v1144_v53 = vpack.c.bf16 %v709_v52, %v709_v52 }
 0x4a0   : > { %v1210_v55 = vpop.f32.mrf.mxu0 }
 0x4a1   : > { %719 = vrot.lane.b32.xlu0 %v1144_v53, %s1584_s29 }
 0x4a2   : > { %v712_v56 = vpop.f32.mrf.mxu0 }
 0x4a4   : > { %v1211_v57 = vpop.f32.mrf.mxu0 }
 0x4a8   : > { %v831_v58 = vpop.f32.mrf.mxu0 }
 0x4a9   : > { %v1145_v59 = vpack.c.bf16 %v831_v58, %v831_v58 }
 0x4aa   : > { %v1222_v60 = vpop.f32.mrf.mxu0 }
 0x4ab   : > { %841 = vrot.lane.b32.xlu1 %v1145_v59, %s1585_s24 }
 0x4ac   : > { %v834_v61 = vpop.f32.mrf.mxu0 }
 0x4ae   : > { %v1223_v62 = vpop.f32.mrf.mxu0 }
 0x4ee   : > { %v598_v63 = vpop.permute.xlu1 %597 }
 0x4ef   : > { %601 = vst.msk [vmem:[#allocation2] sm:$0xf] %vm600_vm5, %v598_v63 }
 0x513   : > { %v720_v1 = vpop.permute.xlu0 %719 }
 0x514   : > { %723 = vst.msk [vmem:[#allocation2] sm:$0xf] %vm722_vm6, %v720_v1 }
 0x51d   : > { %v842_v0 = vpop.permute.xlu1 %841 }
 0x51e   : > { %845 = vst.msk [vmem:[#allocation2] sm:$0xf] %vm844_vm7, %v842_v0 }
 0x525   : > { %v849_v2 = vld [vmem:[#allocation2] sm:$0xf] }
 0x526   : > { %1229 = vmatmul.mubr.msk.bf16.vlgmr.msra.gmra.mxu1 %vm317_vm1, %v849_v2 }
 0x5e6   : > { %v903_v7 = vpop.f32.mrf.mxu1 }
 0x5e7   : > { %v909_v9 = vadd.f32 %v903_v7, %v1769_v3 }
 0x5e8   : > { %v1230_v10 = vpop.f32.mrf.mxu1 }
 0x5e9   : > { %v914_v11 = vadd.f32 %v913_v5, %v909_v9 }
 0x5ea   : > { %v906_v12 = vpop.f32.mrf.mxu1 }
 0x5eb   : > { %v915_v14 = vsel %vm317_vm1, %v914_v11, 0.0  ;;  %v920_v15 = vmul.f32 %v914_v11, %v914_v11 }
 0x5ec   : > { %916 = vadd.xlane.f32.xlu0 %v915_v14  ;;  %v1231_v16 = vpop.f32.mrf.mxu1 }
 0x5ed   : > { %v921_v17 = vsel %vm317_vm1, %v920_v15, 0.0 }
 0x5ee   : > { %922 = vadd.xlane.f32.xlu1 %v921_v17 }
 0x5ef   : > { %1473 = shalt.err (!%p1470_p9)
}
 0x5f0   : > { %s1474_s30 = scalar_lea.hbm %s972_s16, 128  ;;  %s1478_s24 = scalar_lea.hbm %s1928_s5, 256 }
 0x5f1   : > { %p1475_p13 = scmp.ne.s32.totalorder %s972_s16, %s1474_s30  ;;  %p1479_p11 = scmp.lt.s32.totalorder %s972_s16, %s1928_s5 }
 0x5f2   : > { %p1480_p1 = scmp.lt.s32.totalorder %s1478_s24, %s1474_s30 }
 0x5f3   : > { %p1476_p10 = pnand %p1475_p13, %p1946_p6 }
 0x5f4   : > { %p1481_p2 = por %p1480_p1, %p1479_p11 }
 0x5f5   : > { %p1477_p8 = pneg %p1476_p10 }
 0x5f7   : > { %p1482_p4 = pnand %p1481_p2, %p1477_p8 }
 0x5f9   : > { %1485 = shalt.err (!%p1482_p4)
}
 0x5fa   : > { %1247 = dma.vmem_to_hbm [thread:$0]  (%p1946_p6), %s975_s17, 128, %s972_s16, %s948_s10   ;;  %v933_v23 = vsub.s32 2, %v1778_v6  ;;  %v938_v24 = vsub.s32 3, %v1778_v6 }
 0x5fb   : > { %s285_s16 = scalar_lea.vmem [#allocation12], %s1747_s27  ;;  %s959_s11 = scalar_lea.hbm %s1927_s4, %s1139_s26 }
 0x5fc   : > { %v934_v25 = vrot.slane %v1783_v8, %v933_v23  ;;  %v939_v28 = vrot.slane %v1783_v8, %v938_v24  ;;  %s961_s17 = sshll.u32 %s285_s16, 4  ;;  %s943_s9 = scalar_lea.sflag [#allocation6], %s1744_s23  ;;  %s962_s17 = int_to_ptr.vmem [resolvable:$true] %s961_s17 }
 0x5fd   : > { %s1486_s12 = scalar_lea.vmem %s962_s17, 128  ;;  %s1587_s30 = smov [#allocation12]  }
 0x5fe   : > { %p1487_p12 = scmp.ne.s32.totalorder %s962_s17, %s1486_s12  ;;  %s1490_s14 = sshll.u32 %s1587_s30, 4  ;;  %s1491_s14 = int_to_ptr.vmem [resolvable:$false] %s1490_s14 }
 0x5ff   : > { %s1492_s27 = scalar_lea.vmem %s1491_s14, 256  ;;  %p1493_p3 = scmp.lt.s32.totalorder %s962_s17, %s1491_s14 }
 0x600   : > { %p1488_p0 = pnand %p1487_p12, %p1946_p6  ;;  %p1494_p7 = scmp.lt.s32.totalorder %s1492_s27, %s1486_s12 }
 0x602   : > { %p1489_p5 = pneg %p1488_p0  ;;  %p1495_p9 = por %p1494_p7, %p1493_p3 }
 0x604   : > { %p1496_p13 = pnand %p1495_p9, %p1489_p5 }
 0x675   : > { %v917_v3 = vpop.xlane.xlu0 %916 }
 0x676   : > { %v919_v18 = vmul.f32 0.03125, %v917_v3 }
 0x677   : > { %v923_v13 = vpop.xlane.xlu1 %922 }
 0x678   : > { %v925_v19 = vmul.f32 %v919_v18, %v919_v18  ;;  %v924_v20 = vmul.f32 0.03125, %v923_v13  ;;  %v927_v26 = vsub.f32 %v914_v11, %v919_v18 }
 0x67a   : > { %v926_v21 = vsub.f32 %v924_v20, %v925_v19 }
 0x67c   : > { %v928_v22 = vadd.f32 1e-05, %v926_v21 }
 0x67e   : > { %1352 = vrsqrt.f32 %v928_v22 }
 0x68b   : > { %v1353_v27 = vpop.eup %1352 }
 0x68c   : > { %v930_v29 = vmul.f32 %v1353_v27, %v927_v26 }
 0x68e   : > { %v935_v30 = vmul.f32 %v934_v25, %v930_v29 }
 0x690   : > { %v940_v31 = vadd.f32 %v939_v28, %v935_v30 }
 0x692   : > { %941 = vst.msk [vmem:[%s285_s16] sm:$0xff] %vm317_vm1, %v940_v31 }
 0x693   : > { %1499 = shalt.err (!%p1496_p13)
}
 0x694   : > { %s1500_s22 = scalar_lea.hbm %s959_s11, 128  ;;  %s1504_s29 = scalar_lea.hbm %s1927_s4, 256 }
 0x695   : > { %p1501_p10 = scmp.ne.s32.totalorder %s959_s11, %s1500_s22  ;;  %p1505_p1 = scmp.lt.s32.totalorder %s959_s11, %s1927_s4 }
 0x696   : > { %p1506_p2 = scmp.lt.s32.totalorder %s1504_s29, %s1500_s22 }
 0x697   : > { %p1502_p8 = pnand %p1501_p10, %p1946_p6 }
 0x698   : > { %p1507_p4 = por %p1506_p2, %p1505_p1 }
 0x699   : > { %p1503_p11 = pneg %p1502_p8 }
 0x69b   : > { %p1508_p12 = pnand %p1507_p4, %p1503_p11 }
 0x69d   : > { %1511 = shalt.err (!%p1508_p12)
}
 0x69e   : > { %1246 = dma.vmem_to_hbm [thread:$0]  (%p1946_p6), %s962_s17, 128, %s959_s11, %s943_s9  }
 0x69f PF: > { %s986_s15 = sand.u32 1, %s1550_s18   ;;  %p1947_p0 = scmp.ne.s32.totalorder %s1934_s25, 0 }
 0x6a0   : > { %p1948_p5 = scmp.ge.s32.totalorder %s1562_s21, 2  ;;  %s987_s16 = scalar_lea.sflag [#allocation6], %s986_s15 }
 0x6a2   : > { %p1265_p3 = pnand %p1948_p5, %p1947_p0 }
 0x6a4   : > { %p1266_p7 = pneg %p1265_p3 }
 0x6a6   : > { %1541 = dma.done.wait (%p1266_p7), %s987_s16, 128  }
 0x6a7   : > { %1543 = vsyncadd (%p1266_p7), %s987_s16, 4294967168  ;;  %s996_s10 = scalar_lea.sflag [#allocation14], %s986_s15 }
 0x6a8   : > { %1545 = dma.done.wait (%p1266_p7), %s996_s10, 128  }
 0x6a9   : > { %1547 = vsyncadd (%p1266_p7), %s996_s10, 4294967168  ;;  %p24_p6 = scmp.ge.s32.totalorder %s1698_s28, 4   ;;  %s1949_s18 = smov %s1554_s19 }
 0x6aa   : > { %s1950_s19 = smov %s1558_s20  ;;  %s1951_s20 = smov %s1708_s6 }
 0x6ab   : > { %s1952_s21 = smov %s1698_s28  ;;  %26 = sbr.rel (!%p24_p6) target bundleno = 9 (0x9), region = 110 }
 0x6b0   :  { %1001 = vsyncpa [#allocation5], 1 }
 0x6b1   :  { %1003 = vsyncpa [#allocation5 + $0x1], 1 }
 0x6b2   :  { %1004 = vsyncpa [#allocation8], 1 }
 0x6b3   :  { %1005 = vsyncpa [#allocation11], 1 }
 0x6b4   :  { %1006 = vsyncpa [#allocation6], 1 }
 0x6b5   :  { %1008 = vsyncpa [#allocation6 + $0x1], 1 }
 0x6b6   :  { %1009 = vsyncpa [#allocation14], 1 }
 0x6b7   :  { %1011 = vsyncpa [#allocation14 + $0x1], 1 }

// kernel: tpu_custom_call.1
= control target key start
LH: loop header
LB: loop body
LE: loop exit
PB: predicated region body
PF: predicated region fallthrough
CT: control target
= control target key end

     0   :  { %11 = vsyncpa [#allocation5], 0  ;;  %s1923_s0 = inlined_call_operand.hbm [shape: f32[2,8,32], index: 0, kind: input, shape index: {}]   ;;  %s1924_s1 = inlined_call_operand.hbm [shape: bf16[32,96], index: 1, kind: input, shape index: {}]   ;;  %s1925_s2 = inlined_call_operand.hbm [shape: bf16[32,32], index: 2, kind: input, shape index: {}]   ;;  %s1926_s3 = inlined_call_operand.hbm [shape: f32[8,96], index: 3, kind: input, shape index: {}]   ;;  %s1927_s4 = inlined_call_operand.hbm [shape: f32[2,8,32], index: 4, kind: output, shape index: {0}]   ;;  %s1928_s5 = inlined_call_operand.hbm [shape: f32[2,8,8], index: 5, kind: output, shape index: {1}]  }
   0x1   :  { %13 = vsyncpa [#allocation5 + $0x1], 0 }
   0x2   :  { %14 = vsyncpa [#allocation8], 0 }
   0x3   :  { %15 = vsyncpa [#allocation11], 0 }
   0x4   :  { %16 = vsyncpa [#allocation6], 0 }
   0x5   :  { %18 = vsyncpa [#allocation6 + $0x1], 0 }
   0x6   :  { %19 = vsyncpa [#allocation14], 0 }
   0x7   :  { %21 = vsyncpa [#allocation14 + $0x1], 0  ;;  %s1618_s18 = smov 0   ;;  %s1620_s19 = smov 0  }
   0x8   :  { %s1622_s20 = smov 0   ;;  %s1624_s21 = smov 0  }
   0x9 LB: > { %s1639_s22 = sadd.s32 4294967295, %s1562_s21   ;;  %s1105_s23 = sadd.s32 4294967294, %s1562_s21   ;;  %s1562_s21 = sphi %s1624_s21, %s1952_s21   ;;  %s1558_s20 = sphi %s1622_s20, %s1951_s20   ;;  %s1554_s19 = sphi %s1620_s19, %s1950_s19   ;;  %s1550_s18 = sphi %s1618_s18, %s1949_s18  }
   0xa   : > { %p47_p0 = scmp.ne.s32.totalorder %s1554_s19, %s1550_s18  ;;  %p1929_p1 = scmp.eq.s32.totalorder %s1639_s22, 0 }
   0xb   : > { %p140_p3 = scmp.eq.s32.totalorder %s1105_s23, 1  ;;  %p1106_p5 = scmp.ge.s32.totalorder %s1562_s21, 1 }
   0xc   : > { %p1648_p4 = por %p1929_p1, %p47_p0  ;;  %p173_p7 = scmp.lt.s32.totalorder %s1562_s21, 3 }
   0xd   : > { %p1653_p6 = por %p140_p3, %p47_p0  ;;  %s1564_s27 = smov [#allocation7]  }
   0xe   : > { %s1933_s24 = scalar_select %p1648_p4, 1, 0 }
   0xf   : > { %s1934_s25 = scalar_select %p1653_p6, 1, 0 }
  0x10   : > { %p1658_p8 = pnand %p1106_p5, %p173_p7  ;;  %s185_s28 = sshll.u32 %s1564_s27, 4  ;;  %s186_s28 = int_to_ptr.vmem [resolvable:$true] %s185_s28 }
  0x11   : > { %s1565_s30 = smov [#allocation9]   ;;  %s1566_s7 = smov [#allocation10]  }
  0x12   : > { %s1935_s26 = scalar_select %p1658_p8, 1, 0 }
  0x13   : > { %p1250_p9 = pneg %p1658_p8  ;;  %s198_s6 = sshll.u32 %s1565_s30, 4  ;;  %s199_s6 = int_to_ptr.vmem [resolvable:$true] %s198_s6 }
  0x14   : > { %s212_s8 = sshll.u32 %s1566_s7, 4  ;;  %s1365_s9 = scalar_lea.vmem %s186_s28, 256  ;;  %s213_s8 = int_to_ptr.vmem [resolvable:$true] %s212_s8 }
  0x15   : > { %p1667_p11 = pnand %p1250_p9, %p1929_p1  ;;  %p1366_p13 = scmp.ne.s32.totalorder %s186_s28, %s1365_s9 }
  0x16   : > { %p1373_p5 = scmp.lt.s32.totalorder %s186_s28, %s186_s28  ;;  %p1374_p7 = scmp.lt.s32.totalorder %s1365_s9, %s1365_s9 }
  0x17   : > { %p1356_p12 = pneg %p1667_p11 }
  0x18   : > { %p1375_p9 = por %p1374_p7, %p1373_p5 }
  0x19   : > { %p1368_p0 = pnand %p1366_p13, %p1356_p12 }
  0x1b   : > { %p1369_p3 = pneg %p1368_p0 }
  0x1d   : > { %p1376_p10 = pnand %p1375_p9, %p1369_p3 }
  0x1f   : > { %1379 = shalt.err (!%p1376_p10)
}
  0x20   : > { %s1567_s10 = smov 64   ;;  %s1568_s11 = smov 4  }
  0x21   : > { %1253 = dma.hbm_to_vmem [thread:$0]  (!%p1667_p11), %s1924_s1, 256, %s186_s28, [#allocation8], %s1567_s10, %s1567_s10, %s1568_s11  }
  0x22   : > { %s1391_s14 = scalar_lea.vmem %s199_s6, 256  ;;  %p1399_p2 = scmp.lt.s32.totalorder %s199_s6, %s199_s6 }
  0x23   : > { %p1392_p1 = scmp.ne.s32.totalorder %s199_s6, %s1391_s14  ;;  %p1400_p6 = scmp.lt.s32.totalorder %s1391_s14, %s1391_s14 }
  0x25   : > { %p1394_p13 = pnand %p1392_p1, %p1356_p12  ;;  %p1401_p5 = por %p1400_p6, %p1399_p2 }
  0x27   : > { %p1395_p0 = pneg %p1394_p13 }
  0x29   : > { %p1402_p3 = pnand %p1401_p5, %p1395_p0 }
  0x2b   : > { %1405 = shalt.err (!%p1402_p3)
}
  0x2c   : > { %1256 = dma.hbm_to_vmem [thread:$0]  (!%p1667_p11), %s1925_s2, 256, %s199_s6, [#allocation8], %s1567_s10, %s1567_s10, %s1568_s11  }
  0x2d   : > { %s1417_s17 = scalar_lea.vmem %s213_s8, 128  ;;  %p1425_p9 = scmp.lt.s32.totalorder %s213_s8, %s213_s8 }
  0x2e   : > { %p1418_p10 = scmp.ne.s32.totalorder %s213_s8, %s1417_s17  ;;  %p1426_p13 = scmp.lt.s32.totalorder %s1417_s17, %s1417_s17 }
  0x30   : > { %p1420_p7 = pnand %p1418_p10, %p1356_p12  ;;  %p1427_p4 = por %p1426_p13, %p1425_p9 }
  0x32   : > { %p1421_p1 = pneg %p1420_p7 }
  0x34   : > { %p1428_p2 = pnand %p1427_p4, %p1421_p1 }
  0x36   : > { %1431 = shalt.err (!%p1428_p2)
}
  0x37   : > { %1259 = dma.hbm_to_vmem [thread:$0]  (!%p1667_p11), %s1926_s3, 128, %s213_s8, [#allocation11]  }
  0x38   : > { %s1698_s28 = sadd.s32 1, %s1562_s21   ;;  %s34_s29 = sadd.s32 1, %s1558_s20 }
  0x39   : > { %s31_s30 = ssub.s32 %s1562_s21, %s1698_s28  ;;  %p41_p6 = scmp.ne.s32.totalorder %s1558_s20, %s1554_s19 }
  0x3a   : > { %p32_p4 = scmp.eq.s32.totalorder %s31_s30, 0  ;;  %p42_p12 = scmp.eq.s32.totalorder %s1562_s21, 0 }
  0x3b   : > { %p1274_p0 = scmp.lt.s32.totalorder %s1562_s21, 2  ;;  %p1937_p3 = scmp.eq.s32.totalorder %s1639_s22, 1 }
  0x3c   : > { %s1708_s6 = scalar_select %p32_p4, %s1558_s20, %s34_s29  }
  0x3d   : > { %p43_p5 = por %p42_p12, %p41_p6  ;;  %p1712_p10 = por %p1937_p3, %p41_p6 }
  0x3e   : > { %s223_s9 = sand.u32 1, %s1558_s20   ;;  %s1112_s10 = sshll.u32 %s1562_s21, 7 }
  0x3f   : > { %s1938_s7 = scalar_select %p1712_p10, 1, 0 }
  0x40   : > { %s1111_s8 = sshll.u32 %s223_s9, 3  ;;  %s1721_s13 = scalar_lea.hbm %s1923_s0, %s1112_s10 }
  0x41   : > { %s227_s14 = scalar_lea.vmem [#allocation4], %s1111_s8  ;;  %p1723_p11 = pnand %p1274_p0, %p43_p5 }
  0x42   : > { %s234_s15 = sshll.u32 %s227_s14, 4  ;;  %s224_s17 = scalar_lea.sflag [#allocation5], %s223_s9  ;;  %s235_s15 = int_to_ptr.vmem [resolvable:$true] %s234_s15 }
  0x43   : > { %s1432_s23 = scalar_lea.hbm %s1721_s13, 128  ;;  %p1434_p1 = pneg %p1723_p11 }
  0x44   : > { %p1433_p7 = scmp.ne.s32.totalorder %s1721_s13, %s1432_s23  ;;  %s1437_s29 = scalar_lea.hbm %s1923_s0, 256 }
  0x45   : > { %p1438_p2 = scmp.lt.s32.totalorder %s1721_s13, %s1923_s0  ;;  %p1439_p4 = scmp.lt.s32.totalorder %s1437_s29, %s1432_s23 }
  0x46   : > { %p1435_p9 = pnand %p1434_p1, %p1433_p7 }
  0x47   : > { %p1440_p6 = por %p1439_p4, %p1438_p2 }
  0x48   : > { %p1436_p13 = pneg %p1435_p9 }
  0x4a   : > { %p1441_p12 = pnand %p1440_p6, %p1436_p13 }
  0x4c   : > { %1444 = shalt.err (!%p1441_p12)
}
  0x4d   : > { %s1445_s11 = scalar_lea.vmem %s235_s15, 128  ;;  %s1569_s9 = smov [#allocation4]  }
  0x4e   : > { %p1446_p0 = scmp.ne.s32.totalorder %s235_s15, %s1445_s11  ;;  %s1450_s12 = sshll.u32 %s1569_s9, 4  ;;  %s1451_s12 = int_to_ptr.vmem [resolvable:$false] %s1450_s12 }
  0x4f   : > { %s1452_s14 = scalar_lea.vmem %s1451_s12, 256  ;;  %p1453_p7 = scmp.lt.s32.totalorder %s235_s15, %s1451_s12 }
  0x50   : > { %p1448_p5 = pnand %p1446_p0, %p1434_p1  ;;  %p1454_p9 = scmp.lt.s32.totalorder %s1452_s14, %s1445_s11 }
  0x52   : > { %p1449_p3 = pneg %p1448_p5  ;;  %p1455_p10 = por %p1454_p9, %p1453_p7 }
  0x54   : > { %p1456_p8 = pnand %p1455_p10, %p1449_p3 }
  0x56   : > { %1459 = shalt.err (!%p1456_p8)
}
  0x57   : > { %1263 = dma.hbm_to_vmem [thread:$0]  (!%p1723_p11), %s1721_s13, 128, %s235_s15, %s224_s17  }
  0x58   : > { %p1940_p13 = scmp.ne.s32.totalorder %s1935_s26, 0 }
  0x59   : > { %s1744_s23 = sand.u32 (!%p1940_p13), 1, %s1554_s19   ;;  %p1941_p10 = scmp.ne.s32.totalorder (!%p1940_p13), %s1933_s24, 0 }
  0x5a   : > { %243 = sbr.rel (%p1940_p13) target bundleno = 1695 (0x69f), region = 36  ;;  %s1747_s27 = sshll.u32 (!%p1940_p13), %s1744_s23, 3 }
  0x5b   : > { %s246_s30 = scalar_lea.sflag (!%p1940_p13), [#allocation5], %s1744_s23  ;;  %s249_s29 = scalar_lea.vmem (!%p1940_p13), [#allocation4], %s1747_s27 }
  0x5f   : > { %1529 = dma.done.wait (%p1941_p10), %s246_s30, 128  }
  0x60   : > { %1531 = vsyncadd (%p1941_p10), %s246_s30, 4294967168  ;;  %p1942_p8 = scmp.eq.s32.totalorder %s1639_s22, 0 }
  0x62   : > { %1533 = dma.done.wait (%p1942_p8), [#allocation8], 512   ;;  %p1943_p11 = pmov %p1942_p8 }
  0x63   : > { %p1944_p1 = pmov %p1942_p8 }
  0x64   : > { %1535 = vsyncadd (%p1943_p11), [#allocation8], 4294966784 }
  0x65   : > { %1537 = dma.done.wait (%p1944_p1), [#allocation11], 128   ;;  %p1945_p2 = pmov %p1944_p1 }
  0x66   : > { %v1570_v0 = vmov 0.0   ;;  %vm1571_vm0 = vmmov 0   ;;  %v1332_v1 = vld [vmem:[#allocation7 + $0x8] sm:$0xff]   ;;  %v1333_v2 = vld [vmem:[#allocation7] sm:$0xff]   ;;  %v1769_v3 = vld [vmem:[%s249_s29] sm:$0xff]  ;;  %vm317_vm1 = vcmask 261120   ;;  %v301_v5 = vlaneseq }
  0x67   : > { %1539 = vsyncadd (%p1945_p2), [#allocation11], 4294967168  ;;  %1168 = vmatprep.subr.bf16.mxu0 %v1570_v0  ;;  %1172 = vmatprep.mubr.msk.bf16.mxu0 %vm1571_vm0, %v1570_v0  ;;  %v295_v4 = vpack.c.bf16 %v1769_v3, %v1769_v3  ;;  %vm362_vm2 = vcmask 64512   ;;  %v1783_v8 = vld [vmem:[#allocation10] sm:$0xff]  ;;  %s1572_s24 = smov 120   ;;  %s1573_s26 = smov 96  }
  0x68   : > { %1176 = vmatprep.subr.bf16.mxu1 %v1570_v0  ;;  %1178 = vmatprep.mubr.msk.bf16.mxu1 %vm1571_vm0, %v1570_v0  ;;  %v1778_v6 = vshrl.u32 %v301_v5, 7  ;;  %363 = vst.msk [vmem:[#allocation3] sm:$0xff] %vm362_vm2, %v1570_v0  ;;  %s1574_s13 = smov 80   ;;  %s1575_s15 = smov 88   ;;  %vm433_vm3 = vcmask 1043456   ;;  %vm478_vm4 = vcmask 60416  }
  0x69   : > { %1169 = vmatpush3.bf16.msra.mxu0 %v1332_v1  ;;  %s1576_s16 = smov 72   ;;  %s1577_s17 = smov 112   ;;  %vm600_vm5 = vcmask 126016   ;;  %vm722_vm6 = vcmask 191616   ;;  %vm844_vm7 = vcmask 257216  }
  0x6a   : > { %1170 = vmatprep.subr.bf16.mxu0 %v1570_v0  ;;  %v303_v7 = vsub.s32 0, %v1778_v6  ;;  %s1578_s10 = smov 104   ;;  %s1579_s8 = smov 56  }
  0x6b   : > { %s1580_s11 = smov 64   ;;  %s1581_s9 = smov 40  }
  0x6c   : > { %v304_v9 = vrot.slane %v1783_v8, %v303_v7  ;;  %s1582_s12 = smov 48   ;;  %s292_s14 = scalar_lea.vmem [#allocation13], %s1747_s27 }
  0x6d   : > { %1171 = vmatpush3.bf16.msra.mxu0 %v1333_v2  ;;  %s1583_s30 = smov 8   ;;  %s1584_s29 = smov 16  }
  0x6e   : > { %1182 = vmatprep.subr.bf16.mxu0 %v1570_v0  ;;  %p1946_p6 = scmp.ne.s32.totalorder %s1938_s7, 0 }
  0x70   : > { %1173 = vmatmul.mubr.msk.bf16.vlgmr.msra.gmra.mxu0 %vm317_vm1, %v295_v4 }
  0x71   : > { %1184 = vmatprep.mubr.msk.bf16.mxu0 %vm1571_vm0, %v1570_v0 }
 0x130   : > { %v355_v10 = vpop.f32.mrf.mxu0 }
 0x131   : > { %v356_v11 = vadd.f32 %v355_v10, %v304_v9  ;;  %v424_v10 = vld [vmem:[#allocation3] sm:$0xff] }
 0x132   : > { %v1174_v12 = vpop.f32.mrf.mxu0 }
 0x133   : > { %v1786_v13 = vpack.c.bf16 %v356_v11, %v356_v11 }
 0x134   : > { %v358_v14 = vpop.f32.mrf.mxu0 }
 0x135   : > { %480 = vrot.lane.b32.xlu1 %v1786_v13, %s1572_s24  ;;  %365 = vrot.lane.b32.xlu0 %v1786_v13, %s1573_s26  ;;  %s1585_s24 = smov 24   ;;  %s1139_s26 = sshll.u32 %s1639_s22, 7 }
 0x136   : > { %v1175_v15 = vpop.f32.mrf.mxu0 }
 0x139   : > { %604 = vrot.lane.b32.xlu1 %v1786_v13, %s1574_s13  ;;  %482 = vrot.lane.b32.xlu0 %v1786_v13, %s1575_s15 }
 0x13d   : > { %726 = vrot.lane.b32.xlu1 %v1786_v13, %s1576_s16  ;;  %602 = vrot.lane.b32.xlu0 %v1786_v13, %s1577_s17  ;;  %s972_s16 = scalar_lea.hbm %s1928_s5, %s1139_s26  ;;  %s974_s17 = sshll.u32 %s292_s14, 4  ;;  %s975_s17 = int_to_ptr.vmem [resolvable:$true] %s974_s17 }
 0x141   : > { %724 = vrot.lane.b32.xlu0 %v1786_v13, %s1578_s10  ;;  %s948_s10 = scalar_lea.sflag [#allocation14], %s1744_s23 }
 0x1a7   : > { %v366_v16 = vpop.permute.xlu0 %365  ;;  %v481_v19 = vpop.permute.xlu1 %480 }
 0x1a8   : > { %v371_v17 = vsel %vm362_vm2, %v366_v16, 0 }
 0x1a9   : > { %1177 = vmatpush3.bf16.xpose.msra.mxu1 %v371_v17 }
 0x1aa   : > { %1188 = vmatprep.subr.bf16.mxu1 %v1570_v0 }
 0x1ab   : > { %v483_v18 = vpop.permute.xlu0 %482  ;;  %v605_v21 = vpop.permute.xlu1 %604 }
 0x1ac   : > { %v488_v20 = vsel %vm362_vm2, %v483_v18, 0  ;;  %v610_v22 = vsel %vm362_vm2, %v605_v21, 0 }
 0x1af   : > { %v727_v23 = vpop.permute.xlu1 %726  ;;  %v603_v24 = vpop.permute.xlu0 %602 }
 0x1b0   : > { %1179 = vmatmul.mubr.msk.bf16.vlgmr.msra.gmra.mxu1 %vm362_vm2, %v1786_v13  ;;  %v732_v25 = vsel %vm362_vm2, %v727_v23, 0 }
 0x1b1   : > { %1189 = vmatpush3.bf16.xpose.msra.mxu1 %v488_v20  ;;  %1190 = vmatprep.mubr.msk.bf16.mxu1 %vm1571_vm0, %v1570_v0 }
 0x1b2   : > { %1200 = vmatprep.subr.bf16.mxu1 %v1570_v0 }
 0x1b3   : > { %v725_v26 = vpop.permute.xlu0 %724 }
 0x1b8   : > { %1191 = vmatmul.mubr.msk.bf16.vlgmr.msra.gmra.mxu1 %vm362_vm2, %v481_v19 }
 0x1b9   : > { %1201 = vmatpush3.bf16.xpose.msra.mxu1 %v610_v22  ;;  %1202 = vmatprep.mubr.msk.bf16.mxu1 %vm1571_vm0, %v1570_v0 }
 0x1ba   : > { %1212 = vmatprep.subr.bf16.mxu1 %v1570_v0 }
 0x1c0   : > { %1203 = vmatmul.mubr.msk.bf16.vlgmr.msra.gmra.mxu1 %vm362_vm2, %v603_v24 }
 0x1c1   : > { %1213 = vmatpush3.bf16.xpose.msra.mxu1 %v732_v25  ;;  %1214 = vmatprep.mubr.msk.bf16.mxu1 %vm1571_vm0, %v1570_v0 }
 0x1c2   : > { %1224 = vmatprep.subr.bf16.mxu1 %v1570_v0 }
 0x1c8   : > { %1215 = vmatmul.mubr.msk.bf16.vlgmr.msra.gmra.mxu1 %vm362_vm2, %v725_v26 }
 0x1c9   : > { %1228 = vmatprep.mubr.msk.bf16.mxu1 %vm1571_vm0, %v1570_v0 }
 0x270   : > { %v407_v27 = vpop.f32.mrf.mxu1 }
 0x271   : > { %v413_v28 = vsel %vm362_vm2, %v407_v27, -inf }
 0x272   : > { %414 = vmax.xlane.f32.xlu1 %v413_v28  ;;  %v1180_v29 = vpop.f32.mrf.mxu1 }
 0x274   : > { %v410_v30 = vpop.f32.mrf.mxu1 }
 0x276   : > { %v1181_v31 = vpop.f32.mrf.mxu1 }
 0x278   : > { %v524_v32 = vpop.f32.mrf.mxu1 }
 0x279   : > { %v530_v33 = vsel %vm362_vm2, %v524_v32, -inf }
 0x27a   : > { %531 = vmax.xlane.f32.xlu0 %v530_v33  ;;  %v1192_v34 = vpop.f32.mrf.mxu1 }
 0x27c   : > { %v527_v35 = vpop.f32.mrf.mxu1 }
 0x27e   : > { %v1193_v36 = vpop.f32.mrf.mxu1 }
 0x280   : > { %v646_v37 = vpop.f32.mrf.mxu1 }
 0x281   : > { %v652_v38 = vsel %vm362_vm2, %v646_v37, -inf }
 0x282   : > { %653 = vmax.xlane.f32.xlu0 %v652_v38  ;;  %v1204_v39 = vpop.f32.mrf.mxu1 }
 0x284   : > { %v649_v40 = vpop.f32.mrf.mxu1 }
 0x286   : > { %v1205_v41 = vpop.f32.mrf.mxu1 }
 0x288   : > { %v768_v42 = vpop.f32.mrf.mxu1 }
 0x289   : > { %v774_v43 = vsel %vm362_vm2, %v768_v42, -inf }
 0x28a   : > { %775 = vmax.xlane.f32.xlu1 %v774_v43  ;;  %v1216_v44 = vpop.f32.mrf.mxu1 }
 0x28c   : > { %v771_v45 = vpop.f32.mrf.mxu1 }
 0x28e   : > { %v1217_v46 = vpop.f32.mrf.mxu1 }
 0x2fb   : > { %v415_v47 = vpop.xlane.xlu1 %414 }
 0x2fc   : > { %v416_v48 = vsub.f32 %v407_v27, %v415_v47 }
 0x2fe   : > { %v417_v49 = vmul.f32 1.442695, %v416_v48 }
 0x300   : > { %1336 = vpow2.f32 %v417_v49 }
 0x303   : > { %v532_v50 = vpop.xlane.xlu0 %531 }
 0x304   : > { %v533_v51 = vsub.f32 %v524_v32, %v532_v50 }
 0x306   : > { %v534_v52 = vmul.f32 1.442695, %v533_v51  ;;  %v1334_v51 = vld [vmem:[#allocation9 + $0x8] sm:$0xff]  }
 0x307   : > { %1225 = vmatpush3.bf16.msra.mxu1 %v1334_v51 }
 0x308   : > { %1338 = vpow2.f32 %v534_v52  ;;  %1226 = vmatprep.subr.bf16.mxu1 %v1570_v0 }
 0x30b   : > { %v654_v53 = vpop.xlane.xlu0 %653 }
 0x30c   : > { %v655_v54 = vsub.f32 %v646_v37, %v654_v53 }
 0x30d   : > { %v1337_v55 = vpop.eup %1336 }
 0x30e   : > { %v656_v56 = vmul.f32 1.442695, %v655_v54  ;;  %v419_v57 = vsel %vm362_vm2, %v1337_v55, 0.0  ;;  %v1335_v54 = vld [vmem:[#allocation9] sm:$0xff]  }
 0x30f   : > { %420 = vadd.xlane.f32.xlu0 %v419_v57  ;;  %1227 = vmatpush3.bf16.msra.mxu1 %v1335_v54 }
 0x310   : > { %1340 = vpow2.f32 %v656_v56 }
 0x313   : > { %v776_v62 = vpop.xlane.xlu1 %775 }
 0x314   : > { %v777_v63 = vsub.f32 %v768_v42, %v776_v62 }
 0x315   : > { %v1339_v58 = vpop.eup %1338 }
 0x316   : > { %v536_v59 = vsel %vm362_vm2, %v1339_v58, 0.0  ;;  %v778_v1 = vmul.f32 1.442695, %v777_v63 }
 0x317   : > { %537 = vadd.xlane.f32.xlu1 %v536_v59 }
 0x318   : > { %1342 = vpow2.f32 %v778_v1 }
 0x31d   : > { %v1341_v60 = vpop.eup %1340 }
 0x31e   : > { %v658_v61 = vsel %vm362_vm2, %v1341_v60, 0.0 }
 0x31f   : > { %659 = vadd.xlane.f32.xlu0 %v658_v61 }
 0x325   : > { %v1343_v2 = vpop.eup %1342 }
 0x326   : > { %v780_v4 = vsel %vm362_vm2, %v1343_v2, 0.0 }
 0x328   : > { %545 = vrot.lane.b32.xlu1 %v1786_v13, %s1579_s8  ;;  %s1460_s8 = scalar_lea.vmem %s975_s17, 128 }
 0x329   : > { %p1461_p4 = scmp.ne.s32.totalorder %s975_s17, %s1460_s8 }
 0x32b   : > { %p1462_p12 = pnand %p1461_p4, %p1946_p6 }
 0x32d   : > { %p1463_p0 = pneg %p1462_p12 }
 0x335   : > { %428 = vrot.lane.b32.xlu0 %v1786_v13, %s1580_s11  ;;  %s1586_s11 = smov [#allocation13]  }
 0x339   : > { %789 = vrot.lane.b32.xlu0 %v1786_v13, %s1581_s9  ;;  %s1464_s9 = sshll.u32 %s1586_s11, 4  ;;  %s1465_s9 = int_to_ptr.vmem [resolvable:$false] %s1464_s9 }
 0x33a   : > { %p1467_p5 = scmp.lt.s32.totalorder %s975_s17, %s1465_s9 }
 0x34c   : > { %781 = vadd.xlane.f32.xlu1 %v780_v4  ;;  %v912_v4 = vsub.s32 1, %v1778_v6 }
 0x35d   : > { %667 = vrot.lane.b32.xlu1 %v1786_v13, %s1582_s12  ;;  %s1466_s12 = scalar_lea.vmem %s1465_s9, 256 }
 0x35e   : > { %p1468_p3 = scmp.lt.s32.totalorder %s1466_s12, %s1460_s8 }
 0x360   : > { %p1469_p7 = por %p1468_p3, %p1467_p5 }
 0x362   : > { %p1470_p9 = pnand %p1469_p7, %p1463_p0 }
 0x398   : > { %v421_v5 = vpop.xlane.xlu0 %420 }
 0x399   : > { %1344 = vrcp.f32 %v421_v5  ;;  %v913_v5 = vrot.slane %v1783_v8, %v912_v4 }
 0x3a0   : > { %v538_v7 = vpop.xlane.xlu1 %537 }
 0x3a1   : > { %1346 = vrcp.f32 %v538_v7 }
 0x3a4   : > { %v546_v18 = vpop.permute.xlu1 %545 }
 0x3a5   : > { %v551_v19 = vsel %vm433_vm3, %v546_v18, 0 }
 0x3a6   : > { %v1345_v9 = vpop.eup %1344 }
 0x3a7   : > { %v423_v11 = vmul.f32 %v1345_v9, %v1337_v55 }
 0x3a8   : > { %v660_v12 = vpop.xlane.xlu0 %659 }
 0x3a9   : > { %v425_v14 = vadd.f32 %v424_v10, %v423_v11  ;;  %1348 = vrcp.f32 %v660_v12  ;;  %v427_v13 = vpack.c.bf16 %v423_v11, %v423_v11 }
 0x3ab   : > { %426 = vst.msk [vmem:[#allocation3] sm:$0xff] %vm362_vm2, %v425_v14 }
 0x3ac   : > { %v429_v15 = vpop.permute.xlu0 %428 }
 0x3ad   : > { %v435_v16 = vsel %vm433_vm3, %v429_v15, 0 }
 0x3ae   : > { %v1347_v17 = vpop.eup %1346  ;;  %1183 = vmatpush3.bf16.msra.mxu0 %v435_v16 }
 0x3af   : > { %1194 = vmatprep.subr.bf16.mxu0 %v1570_v0  ;;  %v540_v20 = vmul.f32 %v1347_v17, %v1339_v58 }
 0x3b0   : > { %v790_v31 = vpop.permute.xlu0 %789 }
 0x3b1   : > { %1185 = vmatmul.mubr.msk.bf16.vlgmr.msra.gmra.mxu0 %vm362_vm2, %v427_v13  ;;  %v544_v23 = vpack.c.bf16 %v540_v20, %v540_v20  ;;  %v795_v33 = vsel %vm433_vm3, %v790_v31, 0 }
 0x3b2   : > { %1195 = vmatpush3.bf16.msra.mxu0 %v551_v19  ;;  %1196 = vmatprep.mubr.msk.bf16.mxu0 %vm1571_vm0, %v1570_v0  ;;  %v541_v21 = vld [vmem:[#allocation3] sm:$0xff] }
 0x3b3   : > { %v542_v22 = vadd.f32 %v541_v21, %v540_v20  ;;  %1206 = vmatprep.subr.bf16.mxu0 %v1570_v0 }
 0x3b5   : > { %543 = vst.msk [vmem:[#allocation3] sm:$0xff] %vm362_vm2, %v542_v22 }
 0x3b6   : > { %v1349_v24 = vpop.eup %1348 }
 0x3b7   : > { %v662_v25 = vmul.f32 %v1349_v24, %v1341_v60 }
 0x3b9   : > { %1197 = vmatmul.mubr.msk.bf16.vlgmr.msra.gmra.mxu0 %vm362_vm2, %v544_v23  ;;  %v666_v32 = vpack.c.bf16 %v662_v25, %v662_v25 }
 0x3ba   : > { %1208 = vmatprep.mubr.msk.bf16.mxu0 %vm1571_vm0, %v1570_v0 }
 0x3bc   : > { %v663_v26 = vld [vmem:[#allocation3] sm:$0xff] }
 0x3bd   : > { %v664_v27 = vadd.f32 %v663_v26, %v662_v25 }
 0x3bf   : > { %665 = vst.msk [vmem:[#allocation3] sm:$0xff] %vm362_vm2, %v664_v27 }
 0x3c6   : > { %v785_v36 = vld [vmem:[#allocation3] sm:$0xff] }
 0x3d5   : > { %v782_v28 = vpop.xlane.xlu1 %781 }
 0x3d6   : > { %1350 = vrcp.f32 %v782_v28 }
 0x3d9   : > { %v668_v29 = vpop.permute.xlu1 %667 }
 0x3da   : > { %v673_v30 = vsel %vm433_vm3, %v668_v29, 0 }
 0x3db   : > { %1207 = vmatpush3.bf16.msra.mxu0 %v673_v30 }
 0x3dc   : > { %1218 = vmatprep.subr.bf16.mxu0 %v1570_v0 }
 0x3de   : > { %1209 = vmatmul.mubr.msk.bf16.vlgmr.msra.gmra.mxu0 %vm362_vm2, %v666_v32 }
 0x3df   : > { %1219 = vmatpush3.bf16.msra.mxu0 %v795_v33  ;;  %1220 = vmatprep.mubr.msk.bf16.mxu0 %vm1571_vm0, %v1570_v0 }
 0x3e3   : > { %v1351_v34 = vpop.eup %1350 }
 0x3e4   : > { %v784_v35 = vmul.f32 %v1351_v34, %v1343_v2 }
 0x3e6   : > { %v786_v37 = vadd.f32 %v785_v36, %v784_v35  ;;  %v788_v38 = vpack.c.bf16 %v784_v35, %v784_v35 }
 0x3e8   : > { %787 = vst.msk [vmem:[#allocation3] sm:$0xff] %vm362_vm2, %v786_v37  ;;  %1221 = vmatmul.mubr.msk.bf16.vlgmr.msra.gmra.mxu0 %vm362_vm2, %v788_v38 }
 0x3ef   : > { %v846_v39 = vld [vmem:[#allocation3] sm:$0xff] }
 0x3f0   : > { %v847_v40 = vmul.f32 0.25, %v846_v39 }
 0x3f2   : > { %848 = vst.msk [vmem:[%s292_s14] sm:$0xff] %vm362_vm2, %v847_v40 }
 0x471   : > { %v471_v41 = vpop.f32.mrf.mxu0 }
 0x472   : > { %v477_v42 = vpack.c.bf16 %v471_v41, %v471_v41 }
 0x473   : > { %v1186_v43 = vpop.f32.mrf.mxu0 }
 0x474   : > { %479 = vst.msk [vmem:[#allocation2] sm:$0xf] %vm478_vm4, %v477_v42 }
 0x475   : > { %v474_v44 = vpop.f32.mrf.mxu0 }
 0x477   : > { %v1187_v45 = vpop.f32.mrf.mxu0 }
 0x479   : > { %v587_v46 = vpop.f32.mrf.mxu0 }
 0x47a   : > { %v1143_v47 = vpack.c.bf16 %v587_v46, %v587_v46 }
 0x47b   : > { %v1198_v48 = vpop.f32.mrf.mxu0 }
 0x47c   : > { %597 = vrot.lane.b32.xlu1 %v1143_v47, %s1583_s30 }
 0x47d   : > { %v590_v49 = vpop.f32.mrf.mxu0 }
 0x47f   : > { %v1199_v50 = vpop.f32.mrf.mxu0 }
 0x49e   : > { %v709_v52 = vpop.f32.mrf.mxu0 }
 0x49f   : > { %v1144_v53 = vpack.c.bf16 %v709_v52, %v709_v52 }
 0x4a0   : > { %v1210_v55 = vpop.f32.mrf.mxu0 }
 0x4a1   : > { %719 = vrot.lane.b32.xlu0 %v1144_v53, %s1584_s29 }
 0x4a2   : > { %v712_v56 = vpop.f32.mrf.mxu0 }
 0x4a4   : > { %v1211_v57 = vpop.f32.mrf.mxu0 }
 0x4a8   : > { %v831_v58 = vpop.f32.mrf.mxu0 }
 0x4a9   : > { %v1145_v59 = vpack.c.bf16 %v831_v58, %v831_v58 }
 0x4aa   : > { %v1222_v60 = vpop.f32.mrf.mxu0 }
 0x4ab   : > { %841 = vrot.lane.b32.xlu1 %v1145_v59, %s1585_s24 }
 0x4ac   : > { %v834_v61 = vpop.f32.mrf.mxu0 }
 0x4ae   : > { %v1223_v62 = vpop.f32.mrf.mxu0 }
 0x4ee   : > { %v598_v63 = vpop.permute.xlu1 %597 }
 0x4ef   : > { %601 = vst.msk [vmem:[#allocation2] sm:$0xf] %vm600_vm5, %v598_v63 }
 0x513   : > { %v720_v1 = vpop.permute.xlu0 %719 }
 0x514   : > { %723 = vst.msk [vmem:[#allocation2] sm:$0xf] %vm722_vm6, %v720_v1 }
 0x51d   : > { %v842_v0 = vpop.permute.xlu1 %841 }
 0x51e   : > { %845 = vst.msk [vmem:[#allocation2] sm:$0xf] %vm844_vm7, %v842_v0 }
 0x525   : > { %v849_v2 = vld [vmem:[#allocation2] sm:$0xf] }
 0x526   : > { %1229 = vmatmul.mubr.msk.bf16.vlgmr.msra.gmra.mxu1 %vm317_vm1, %v849_v2 }
 0x5e6   : > { %v903_v7 = vpop.f32.mrf.mxu1 }
 0x5e7   : > { %v909_v9 = vadd.f32 %v903_v7, %v1769_v3 }
 0x5e8   : > { %v1230_v10 = vpop.f32.mrf.mxu1 }
 0x5e9   : > { %v914_v11 = vadd.f32 %v913_v5, %v909_v9 }
 0x5ea   : > { %v906_v12 = vpop.f32.mrf.mxu1 }
 0x5eb   : > { %v915_v14 = vsel %vm317_vm1, %v914_v11, 0.0  ;;  %v920_v15 = vmul.f32 %v914_v11, %v914_v11 }
 0x5ec   : > { %916 = vadd.xlane.f32.xlu0 %v915_v14  ;;  %v1231_v16 = vpop.f32.mrf.mxu1 }
 0x5ed   : > { %v921_v17 = vsel %vm317_vm1, %v920_v15, 0.0 }
 0x5ee   : > { %922 = vadd.xlane.f32.xlu1 %v921_v17 }
 0x5ef   : > { %1473 = shalt.err (!%p1470_p9)
}
 0x5f0   : > { %s1474_s30 = scalar_lea.hbm %s972_s16, 128  ;;  %s1478_s24 = scalar_lea.hbm %s1928_s5, 256 }
 0x5f1   : > { %p1475_p13 = scmp.ne.s32.totalorder %s972_s16, %s1474_s30  ;;  %p1479_p11 = scmp.lt.s32.totalorder %s972_s16, %s1928_s5 }
 0x5f2   : > { %p1480_p1 = scmp.lt.s32.totalorder %s1478_s24, %s1474_s30 }
 0x5f3   : > { %p1476_p10 = pnand %p1475_p13, %p1946_p6 }
 0x5f4   : > { %p1481_p2 = por %p1480_p1, %p1479_p11 }
 0x5f5   : > { %p1477_p8 = pneg %p1476_p10 }
 0x5f7   : > { %p1482_p4 = pnand %p1481_p2, %p1477_p8 }
 0x5f9   : > { %1485 = shalt.err (!%p1482_p4)
}
 0x5fa   : > { %1247 = dma.vmem_to_hbm [thread:$0]  (%p1946_p6), %s975_s17, 128, %s972_s16, %s948_s10   ;;  %v933_v23 = vsub.s32 2, %v1778_v6  ;;  %v938_v24 = vsub.s32 3, %v1778_v6 }
 0x5fb   : > { %s285_s16 = scalar_lea.vmem [#allocation12], %s1747_s27  ;;  %s959_s11 = scalar_lea.hbm %s1927_s4, %s1139_s26 }
 0x5fc   : > { %v934_v25 = vrot.slane %v1783_v8, %v933_v23  ;;  %v939_v28 = vrot.slane %v1783_v8, %v938_v24  ;;  %s961_s17 = sshll.u32 %s285_s16, 4  ;;  %s943_s9 = scalar_lea.sflag [#allocation6], %s1744_s23  ;;  %s962_s17 = int_to_ptr.vmem [resolvable:$true] %s961_s17 }
 0x5fd   : > { %s1486_s12 = scalar_lea.vmem %s962_s17, 128  ;;  %s1587_s30 = smov [#allocation12]  }
 0x5fe   : > { %p1487_p12 = scmp.ne.s32.totalorder %s962_s17, %s1486_s12  ;;  %s1490_s14 = sshll.u32 %s1587_s30, 4  ;;  %s1491_s14 = int_to_ptr.vmem [resolvable:$false] %s1490_s14 }
 0x5ff   : > { %s1492_s27 = scalar_lea.vmem %s1491_s14, 256  ;;  %p1493_p3 = scmp.lt.s32.totalorder %s962_s17, %s1491_s14 }
 0x600   : > { %p1488_p0 = pnand %p1487_p12, %p1946_p6  ;;  %p1494_p7 = scmp.lt.s32.totalorder %s1492_s27, %s1486_s12 }
 0x602   : > { %p1489_p5 = pneg %p1488_p0  ;;  %p1495_p9 = por %p1494_p7, %p1493_p3 }
 0x604   : > { %p1496_p13 = pnand %p1495_p9, %p1489_p5 }
 0x675   : > { %v917_v3 = vpop.xlane.xlu0 %916 }
 0x676   : > { %v919_v18 = vmul.f32 0.03125, %v917_v3 }
 0x677   : > { %v923_v13 = vpop.xlane.xlu1 %922 }
 0x678   : > { %v925_v19 = vmul.f32 %v919_v18, %v919_v18  ;;  %v924_v20 = vmul.f32 0.03125, %v923_v13  ;;  %v927_v26 = vsub.f32 %v914_v11, %v919_v18 }
 0x67a   : > { %v926_v21 = vsub.f32 %v924_v20, %v925_v19 }
 0x67c   : > { %v928_v22 = vadd.f32 1e-05, %v926_v21 }
 0x67e   : > { %1352 = vrsqrt.f32 %v928_v22 }
 0x68b   : > { %v1353_v27 = vpop.eup %1352 }
 0x68c   : > { %v930_v29 = vmul.f32 %v1353_v27, %v927_v26 }
 0x68e   : > { %v935_v30 = vmul.f32 %v934_v25, %v930_v29 }
 0x690   : > { %v940_v31 = vadd.f32 %v939_v28, %v935_v30 }
 0x692   : > { %941 = vst.msk [vmem:[%s285_s16] sm:$0xff] %vm317_vm1, %v940_v31 }
 0x693   : > { %1499 = shalt.err (!%p1496_p13)
}
 0x694   : > { %s1500_s22 = scalar_lea.hbm %s959_s11, 128  ;;  %s1504_s29 = scalar_lea.hbm %s1927_s4, 256 }
 0x695   : > { %p1501_p10 = scmp.ne.s32.totalorder %s959_s11, %s1500_s22  ;;  %p1505_p1 = scmp.lt.s32.totalorder %s959_s11, %s1927_s4 }
 0x696   : > { %p1506_p2 = scmp.lt.s32.totalorder %s1504_s29, %s1500_s22 }
 0x697   : > { %p1502_p8 = pnand %p1501_p10, %p1946_p6 }
 0x698   : > { %p1507_p4 = por %p1506_p2, %p1505_p1 }
 0x699   : > { %p1503_p11 = pneg %p1502_p8 }
 0x69b   : > { %p1508_p12 = pnand %p1507_p4, %p1503_p11 }
 0x69d   : > { %1511 = shalt.err (!%p1508_p12)
}
 0x69e   : > { %1246 = dma.vmem_to_hbm [thread:$0]  (%p1946_p6), %s962_s17, 128, %s959_s11, %s943_s9  }
 0x69f PF: > { %s986_s15 = sand.u32 1, %s1550_s18   ;;  %p1947_p0 = scmp.ne.s32.totalorder %s1934_s25, 0 }
 0x6a0   : > { %p1948_p5 = scmp.ge.s32.totalorder %s1562_s21, 2  ;;  %s987_s16 = scalar_lea.sflag [#allocation6], %s986_s15 }
 0x6a2   : > { %p1265_p3 = pnand %p1948_p5, %p1947_p0 }
 0x6a4   : > { %p1266_p7 = pneg %p1265_p3 }
 0x6a6   : > { %1541 = dma.done.wait (%p1266_p7), %s987_s16, 128  }
 0x6a7   : > { %1543 = vsyncadd (%p1266_p7), %s987_s16, 4294967168  ;;  %s996_s10 = scalar_lea.sflag [#allocation14], %s986_s15 }
 0x6a8   : > { %1545 = dma.done.wait (%p1266_p7), %s996_s10, 128  }
 0x6a9   : > { %1547 = vsyncadd (%p1266_p7), %s996_s10, 4294967168  ;;  %p24_p6 = scmp.ge.s32.totalorder %s1698_s28, 4   ;;  %s1949_s18 = smov %s1554_s19 }
 0x6aa   : > { %s1950_s19 = smov %s1558_s20  ;;  %s1951_s20 = smov %s1708_s6 }
 0x6ab   : > { %s1952_s21 = smov %s1698_s28  ;;  %26 = sbr.rel (!%p24_p6) target bundleno = 9 (0x9), region = 110 }
 0x6b0   :  { %1001 = vsyncpa [#allocation5], 1 }
 0x6b1   :  { %1003 = vsyncpa [#allocation5 + $0x1], 1 }
 0x6b2   :  { %1004 = vsyncpa [#allocation8], 1 }
 0x6b3   :  { %1005 = vsyncpa [#allocation11], 1 }
 0x6b4   :  { %1006 = vsyncpa [#allocation6], 1 }
 0x6b5   :  { %1008 = vsyncpa [#allocation6 + $0x1], 1 }
 0x6b6   :  { %1009 = vsyncpa [#allocation14], 1 }
 0x6b7   :  { %1011 = vsyncpa [#allocation14 + $0x1], 1 }

</bundles_post_ra>
